<compile_context>
chip_gen: v7x
topology: tpu7x:2x2x1
jax: 0.10.0
libtpu: 0.0.40
codegen_flags: <defaults>
</compile_context>

<pallas_src>
import jax
import jax.numpy as jnp
from jax.experimental import pallas as pl
from jax.experimental.pallas import tpu as pltpu


# ----------------------------------------------------------------------------
# Fused ATTNFusionCell kernel (one grid step per batch element).
# ----------------------------------------------------------------------------
def _attn_cell_kernel(a_ref, b_ref,
                      wr_ref, br_ref, gr_ref, ber_ref,
                      wa_ref, ba_ref, ga_ref, bea_ref,
                      mmean_ref, se_ref,
                      sk_ref, tk_ref, sv_ref, tv_ref,
                      o_ref):
    eps_ln = 1e-8
    a = a_ref[0]            # (Ca, Ta*Fa)  -- lane-dense slab of tensor_a
    x = b_ref[0]            # (Cb, Tb)

    def cln(y, g, be):      # channel-wise LayerNorm (cLN): normalize over dim 0
        m = jnp.mean(y, axis=0, keepdims=True)
        v = jnp.mean((y - m) * (y - m), axis=0, keepdims=True)
        return (y - m) * jax.lax.rsqrt(v + eps_ln) * g + be

    # resize(tensor_b): grouped 1x1 conv (block-diagonal dense weight) + cLN
    y_r = cln(jnp.dot(wr_ref[...], x, preferred_element_type=jnp.float32)
              + br_ref[...], gr_ref[...], ber_ref[...])              # (Ca, Tb)

    # attention_embed(tensor_b) + cLN, mean over kernel_size outputs, softmax(Tb)
    y_a = cln(jnp.dot(wa_ref[...], x, preferred_element_type=jnp.float32)
              + ba_ref[...], ga_ref[...], bea_ref[...])              # (k*Ca, Tb)
    att = jnp.dot(mmean_ref[...], y_a,
                  preferred_element_type=jnp.float32)                # (Ca, Tb)
    att_max = jnp.max(att, axis=-1, keepdims=True)
    att_exp = jnp.exp(att - att_max)
    att = att_exp / jnp.sum(att_exp, axis=-1, keepdims=True)

    # nearest-neighbour interpolate Tb -> Ta AND broadcast over Fa in a single
    # matmul with the constant one-hot expansion matrix SE (Tb, Ta*Fa).
    se = se_ref[...]
    b_full = jnp.dot(y_r, se, preferred_element_type=jnp.float32)    # (Ca, Ta*Fa)
    att_full = jnp.dot(att, se, preferred_element_type=jnp.float32)  # (Ca, Ta*Fa)

    # key/value embeds: depthwise 1x1 conv + eval-mode BatchNorm2d folded into
    # a per-channel scale/shift (broadcast over the lane-dense axis).
    key = jnp.maximum(a * sk_ref[...] + tk_ref[...], 0.0)
    val = a * sv_ref[...] + tv_ref[...]

    o_ref[0] = (key * b_full + val * att_full).astype(o_ref.dtype)


def _grouped_to_dense(w, groups):
    """(Cout, Cin//groups) grouped 1x1-conv weight -> dense block-diag (Cout, Cin)."""
    cout, cg = w.shape
    og = cout // groups
    sel = (jnp.arange(cout)[:, None] // og == jnp.arange(groups)[None, :])
    dense = sel[:, :, None].astype(w.dtype) * w[:, None, :]
    return dense.reshape(cout, groups * cg)


def attn_fusion_cell_pallas(p, tensor_a, tensor_b, kernel_size):
    """ATTNFusionCell.forward as a single fused Pallas kernel (is2d=True path)."""
    assert tensor_a.ndim == 4 and tensor_b.ndim == 3
    B, Ca, Ta, Fa = tensor_a.shape
    Bb, Cb, Tb = tensor_b.shape
    assert Bb == B and Cb % Ca == 0
    k = kernel_size
    TF = Ta * Fa
    f32 = jnp.float32
    col = lambda v: v.reshape(-1, 1).astype(f32)

    # --- fold parameters into kernel-friendly operands (tiny, O(C^2) work) ---
    w_r = _grouped_to_dense(p['resize_w'], Ca)                       # (Ca, Cb)
    w_a = _grouped_to_dense(p['att_w'], Ca)                          # (k*Ca, Cb)
    b_r, g_r, be_r = col(p['resize_b']), col(p['resize_g']), col(p['resize_be'])
    b_a, g_a, be_a = col(p['att_b']), col(p['att_g']), col(p['att_be'])

    inv_k = p['key_g'] / jnp.sqrt(p['key_rv'] + 1e-5)                # BN folding
    s_k, t_k = col(p['key_w'] * inv_k), col(p['key_be'] - p['key_rm'] * inv_k)
    inv_v = p['val_g'] / jnp.sqrt(p['val_rv'] + 1e-5)
    s_v, t_v = col(p['val_w'] * inv_v), col(p['val_be'] - p['val_rm'] * inv_v)

    # mean over the kernel_size outputs of each group, as a (Ca, k*Ca) matmul
    m_mean = (jnp.arange(k * Ca)[None, :] // k
              == jnp.arange(Ca)[:, None]).astype(f32) / k
    # nearest interpolation Tb->Ta fused with broadcast over Fa: (Tb, Ta*Fa)
    idx = (jnp.arange(Ta) * Tb) // Ta
    onehot = (idx[None, :] == jnp.arange(Tb)[:, None]).astype(f32)   # (Tb, Ta)
    se = jnp.repeat(onehot, Fa, axis=1)                              # (Tb, Ta*Fa)

    # free metadata reshape -> lane-dense slab (last dim Ta*Fa, multiple of 128)
    a2 = tensor_a.reshape(B, Ca, TF).astype(f32)
    bx = tensor_b.astype(f32)

    def _param_spec(arr):
        nd = arr.ndim
        return pl.BlockSpec(arr.shape, lambda b, _nd=nd: (0,) * _nd)

    out = pl.pallas_call(
        _attn_cell_kernel,
        out_shape=jax.ShapeDtypeStruct((B, Ca, TF), tensor_a.dtype),
        grid=(B,),
        in_specs=[
            pl.BlockSpec((1, Ca, TF), lambda b: (b, 0, 0)),
            pl.BlockSpec((1, Cb, Tb), lambda b: (b, 0, 0)),
            _param_spec(w_r), _param_spec(b_r), _param_spec(g_r), _param_spec(be_r),
            _param_spec(w_a), _param_spec(b_a), _param_spec(g_a), _param_spec(be_a),
            _param_spec(m_mean), _param_spec(se),
            _param_spec(s_k), _param_spec(t_k), _param_spec(s_v), _param_spec(t_v),
        ],
        out_specs=pl.BlockSpec((1, Ca, TF), lambda b: (b, 0, 0)),
        compiler_params=pltpu.CompilerParams(
            dimension_semantics=("parallel",)),   # v7x: shard batch over 2 TCs
    )(a2, bx, w_r, b_r, g_r, be_r, w_a, b_a, g_a, be_a,
      m_mean, se, s_k, t_k, s_v, t_v)

    return out.reshape(B, Ca, Ta, Fa)


# ----------------------------------------------------------------------------
# Parameter init (PyTorch-layout params, eval-mode BatchNorm buffers).
# ----------------------------------------------------------------------------
def init_attn_cell_params(key, in_chan_a, in_chan_b, kernel_size):
    assert in_chan_b % in_chan_a == 0, "groups=in_chan_a needs in_chan_b % in_chan_a == 0"
    ca, k, cg = in_chan_a, kernel_size, in_chan_b // in_chan_a
    ks = jax.random.split(key, 16)
    n = lambda kk, shape, s=0.5: s * jax.random.normal(kk, shape, jnp.float32)
    return dict(
        # key_embed: depthwise conv (no bias) + BatchNorm2d (eval) + ReLU
        key_w=n(ks[0], (ca,)),
        key_g=1.0 + 0.1 * jax.random.normal(ks[1], (ca,), jnp.float32),
        key_be=n(ks[2], (ca,), 0.1),
        key_rm=n(ks[3], (ca,), 0.1),
        key_rv=0.8 + 0.4 * jax.random.uniform(ks[4], (ca,), jnp.float32),
        # value_embed: depthwise conv (no bias) + BatchNorm2d (eval)
        val_w=n(ks[5], (ca,)),
        val_g=1.0 + 0.1 * jax.random.normal(ks[6], (ca,), jnp.float32),
        val_be=n(ks[7], (ca,), 0.1),
        val_rm=n(ks[8], (ca,), 0.1),
        val_rv=0.8 + 0.4 * jax.random.uniform(ks[9], (ca,), jnp.float32),
        # attention_embed: grouped 1x1 Conv1d (+bias) + cLN
        att_w=n(ks[10], (k * ca, cg)),
        att_b=n(ks[11], (k * ca,), 0.1),
        att_g=1.0 + 0.1 * jax.random.normal(ks[12], (k * ca,), jnp.float32),
        att_be=jnp.zeros((k * ca,), jnp.float32),
        # resize: grouped 1x1 Conv1d (+bias) + cLN
        resize_w=n(ks[13], (ca, cg)),
        resize_b=n(ks[14], (ca,), 0.1),
        resize_g=1.0 + 0.1 * jax.random.normal(ks[15], (ca,), jnp.float32),
        resize_be=jnp.zeros((ca,), jnp.float32),
    )


# ----------------------------------------------------------------------------
# Module classes mirroring the PyTorch structure.
# ----------------------------------------------------------------------------
class FusionBasemodule:
    def __init__(self, ain_chan, vin_chan, kernel_size, video_fusion, is2d, causal=False):
        self.ain_chan, self.vin_chan = ain_chan, vin_chan
        self.kernel_size = kernel_size
        self.video_fusion = video_fusion
        self.is2d = is2d
        self.causal = causal
        self.x = False
        self.y = False

    def forward(self, audio, video):
        raise NotImplementedError

    # Pure metadata — no Pallas copies, no HBM traffic (perf-review item #1).
    def wrangle_dims(self, audio, video):
        T1 = audio.shape[-(len(audio.shape) // 2):]
        T2 = video.shape[-(len(video.shape) // 2):]
        self.x = len(T1) > len(T2)
        self.y = len(T2) > len(T1)
        video = jnp.expand_dims(video, -1) if self.x else video
        audio = jnp.expand_dims(audio, -1) if self.y else audio
        return audio, video

    def unwrangle_dims(self, audio, video):
        video = jnp.squeeze(video, -1) if self.x else video
        audio = jnp.squeeze(audio, -1) if self.y else audio
        return audio, video


class ATTNFusion(FusionBasemodule):
    def __init__(self, ain_chan, vin_chan, kernel_size, video_fusion=True,
                 is2d=True, *, key):
        super().__init__(ain_chan, vin_chan, kernel_size, video_fusion, is2d)
        k1, k2 = jax.random.split(key)
        if video_fusion:
            self.video_lstm = init_attn_cell_params(k1, vin_chan, ain_chan, kernel_size)
        self.audio_lstm = init_attn_cell_params(k2, ain_chan, vin_chan, kernel_size)

    def __call__(self, audio, video):
        if self.video_fusion:
            video_fused = attn_fusion_cell_pallas(self.video_lstm, video, audio,
                                                  self.kernel_size)
        else:
            video_fused = video
        audio_fused = attn_fusion_cell_pallas(self.audio_lstm, audio, video,
                                              self.kernel_size)
        return audio_fused, video_fused

    forward = __call__


# ----------------------------------------------------------------------------
# Pure-JAX reference mirroring the PyTorch ops (for correctness check).
# ----------------------------------------------------------------------------
def _attn_fusion_cell_reference(p, a, b, k):
    B, Ca, Ta, Fa = a.shape
    _, Cb, Tb = b.shape
    hp = 'highest'

    def grouped_conv1x1(x, w, bias, groups):
        Bx, Cin, T = x.shape
        Cout = w.shape[0]
        xg = x.reshape(Bx, groups, Cin // groups, T)
        wg = w.reshape(groups, Cout // groups, Cin // groups)
        y = jnp.einsum('bgit,goi->bgot', xg, wg, precision=hp)
        return y.reshape(Bx, Cout, T) + bias[None, :, None]

    def cln(x, g, be):
        m = jnp.mean(x, axis=1, keepdims=True)
        v = jnp.mean((x - m) ** 2, axis=1, keepdims=True)
        return (x - m) / jnp.sqrt(v + 1e-8) * g[None, :, None] + be[None, :, None]

    def bn2d(x, g, be, rm, rv):
        inv = g / jnp.sqrt(rv + 1e-5)
        return ((x - rm[None, :, None, None]) * inv[None, :, None, None]
                + be[None, :, None, None])

    idx = (jnp.arange(Ta) * Tb) // Ta
    resized = cln(grouped_conv1x1(b, p['resize_w'], p['resize_b'], Ca),
                  p['resize_g'], p['resize_be'])
    b_t = resized[:, :, idx][..., None]

    key = jax.nn.relu(bn2d(a * p['key_w'][None, :, None, None],
                           p['key_g'], p['key_be'], p['key_rm'], p['key_rv']))
    val = bn2d(a * p['val_w'][None, :, None, None],
               p['val_g'], p['val_be'], p['val_rm'], p['val_rv'])

    att = cln(grouped_conv1x1(b, p['att_w'], p['att_b'], Ca),
              p['att_g'], p['att_be'])
    att = att.reshape(B, Ca, k, Tb).mean(axis=2)
    att = jax.nn.softmax(att, axis=-1)
    att = att[:, :, idx][..., None]

    return key * b_t + att * val


# ----------------------------------------------------------------------------
# Demo / smoke test.
# ----------------------------------------------------------------------------
if __name__ == "__main__":
    key = jax.random.PRNGKey(0)
    k_p, k_a, k_v = jax.random.split(key, 3)

    B, Ca, Cv, Ta, Fa, Tv, K = 2, 16, 16, 16, 128, 8, 4
    audio = jax.random.normal(k_a, (B, Ca, Ta, Fa), jnp.float32)   # (B, C, T, F)
    video = jax.random.normal(k_v, (B, Cv, Tv), jnp.float32)       # (B, C, Tv)

    # video_fusion=False: see TODO(synk) at the top — the video_fusion=True path
    # cannot execute for any consistent (audio, video) rank pair in the PyTorch
    # reference either; the Pallas cell is shared by both branches.
    model = ATTNFusion(ain_chan=Ca, vin_chan=Cv, kernel_size=K,
                       video_fusion=False, is2d=True, key=k_p)

    audio_fused, video_fused = jax.jit(model.__call__)(audio, video)
    audio_fused = jax.block_until_ready(audio_fused)
    video_fused = jax.block_until_ready(video_fused)

    assert audio_fused.shape == (B, Ca, Ta, Fa), audio_fused.shape
    assert video_fused.shape == video.shape

    ref = _attn_fusion_cell_reference(model.audio_lstm, audio, video, K)
    err = float(jnp.max(jnp.abs(audio_fused - ref)))
    assert jnp.allclose(audio_fused, ref, rtol=3e-2, atol=3e-2), f"max abs err {err}"
    assert jnp.array_equal(video_fused, video)

    # Base-class dim wrangling: pure metadata, round-trips exactly.
    a_w, v_w = model.wrangle_dims(audio, video)
    assert a_w.shape == (B, Ca, Ta, Fa) and v_w.shape == (B, Cv, Tv, 1)
    a_u, v_u = model.unwrangle_dims(a_w, v_w)
    assert a_u.shape == audio.shape and v_u.shape == video.shape
    assert jnp.array_equal(a_u, audio) and jnp.array_equal(v_u, video)

    print("KERNEL_OK")
</pallas_src>

<mosaic_0001>
module attributes {stable_mosaic.version = 11 : i64} {
  func.func @_attn_cell_kernel(%arg0: i32, %arg1: memref<1x16x2048xf32, #tpu.memory_space<vmem>>, %arg2: memref<1x16x8xf32, #tpu.memory_space<vmem>>, %arg3: memref<16x16xf32, #tpu.memory_space<vmem>>, %arg4: memref<16x1xf32, #tpu.memory_space<vmem>>, %arg5: memref<16x1xf32, #tpu.memory_space<vmem>>, %arg6: memref<16x1xf32, #tpu.memory_space<vmem>>, %arg7: memref<64x16xf32, #tpu.memory_space<vmem>>, %arg8: memref<64x1xf32, #tpu.memory_space<vmem>>, %arg9: memref<64x1xf32, #tpu.memory_space<vmem>>, %arg10: memref<64x1xf32, #tpu.memory_space<vmem>>, %arg11: memref<16x64xf32, #tpu.memory_space<vmem>>, %arg12: memref<8x2048xf32, #tpu.memory_space<vmem>>, %arg13: memref<16x1xf32, #tpu.memory_space<vmem>>, %arg14: memref<16x1xf32, #tpu.memory_space<vmem>>, %arg15: memref<16x1xf32, #tpu.memory_space<vmem>>, %arg16: memref<16x1xf32, #tpu.memory_space<vmem>>, %arg17: memref<1x16x2048xf32, #tpu.memory_space<vmem>>) attributes {dimension_semantics = [#tpu.dimension_semantics<parallel>], iteration_bounds = array<i64: 2>, scalar_prefetch = 0 : i64, scratch_operands = 0 : i64, tpu.core_type = #tpu.core_type<tc>, window_params = [{transform_indices = @transform_0, window_bounds = array<i64: 1, 16, 2048>}, {transform_indices = @transform_1, window_bounds = array<i64: 1, 16, 8>}, {pipeline_mode = #tpu.pipeline_mode<synchronous>, transform_indices = @transform_2, window_bounds = array<i64: 16, 16>}, {pipeline_mode = #tpu.pipeline_mode<synchronous>, transform_indices = @transform_3, window_bounds = array<i64: 16, 1>}, {pipeline_mode = #tpu.pipeline_mode<synchronous>, transform_indices = @transform_4, window_bounds = array<i64: 16, 1>}, {pipeline_mode = #tpu.pipeline_mode<synchronous>, transform_indices = @transform_5, window_bounds = array<i64: 16, 1>}, {pipeline_mode = #tpu.pipeline_mode<synchronous>, transform_indices = @transform_6, window_bounds = array<i64: 64, 16>}, {pipeline_mode = #tpu.pipeline_mode<synchronous>, transform_indices = @transform_7, window_bounds = array<i64: 64, 1>}, {pipeline_mode = #tpu.pipeline_mode<synchronous>, transform_indices = @transform_8, window_bounds = array<i64: 64, 1>}, {pipeline_mode = #tpu.pipeline_mode<synchronous>, transform_indices = @transform_9, window_bounds = array<i64: 64, 1>}, {pipeline_mode = #tpu.pipeline_mode<synchronous>, transform_indices = @transform_10, window_bounds = array<i64: 16, 64>}, {pipeline_mode = #tpu.pipeline_mode<synchronous>, transform_indices = @transform_11, window_bounds = array<i64: 8, 2048>}, {pipeline_mode = #tpu.pipeline_mode<synchronous>, transform_indices = @transform_12, window_bounds = array<i64: 16, 1>}, {pipeline_mode = #tpu.pipeline_mode<synchronous>, transform_indices = @transform_13, window_bounds = array<i64: 16, 1>}, {pipeline_mode = #tpu.pipeline_mode<synchronous>, transform_indices = @transform_14, window_bounds = array<i64: 16, 1>}, {pipeline_mode = #tpu.pipeline_mode<synchronous>, transform_indices = @transform_15, window_bounds = array<i64: 16, 1>}, {transform_indices = @transform_16, window_bounds = array<i64: 1, 16, 2048>}]} {
    %c0 = arith.constant 0 : index
    %c0_0 = arith.constant 0 : index
    %c0_1 = arith.constant 0 : index
    %0 = vector.load %arg1[%c0, %c0_0, %c0_1] : memref<1x16x2048xf32, #tpu.memory_space<vmem>>, vector<1x16x2048xf32>
    %1 = vector.shape_cast %0 : vector<1x16x2048xf32> to vector<16x2048xf32>
    %c0_2 = arith.constant 0 : index
    %c0_3 = arith.constant 0 : index
    %c0_4 = arith.constant 0 : index
    %2 = vector.load %arg2[%c0_2, %c0_3, %c0_4] : memref<1x16x8xf32, #tpu.memory_space<vmem>>, vector<1x16x8xf32>
    %3 = vector.shape_cast %2 : vector<1x16x8xf32> to vector<16x8xf32>
    %c0_5 = arith.constant 0 : index
    %c0_6 = arith.constant 0 : index
    %4 = vector.load %arg3[%c0_5, %c0_6] : memref<16x16xf32, #tpu.memory_space<vmem>>, vector<16x16xf32>
    %cst = arith.constant dense<0.000000e+00> : vector<16x8xf32>
    %5 = tpu.matmul %4, %3, %cst {dimension_numbers = #tpu.dot_dimension_numbers<[1], [0], [0], [1], [0, 0, 1, 1], [], []>} : vector<16x16xf32>, vector<16x8xf32>, vector<16x8xf32> -> vector<16x8xf32>
    %c0_7 = arith.constant 0 : index
    %c0_8 = arith.constant 0 : index
    %6 = vector.load %arg4[%c0_7, %c0_8] : memref<16x1xf32, #tpu.memory_space<vmem>>, vector<16x1xf32>
    %7 = vector.broadcast %6 : vector<16x1xf32> to vector<16x8xf32>
    %8 = arith.addf %5, %7 : vector<16x8xf32>
    %c0_9 = arith.constant 0 : index
    %c0_10 = arith.constant 0 : index
    %9 = vector.load %arg5[%c0_9, %c0_10] : memref<16x1xf32, #tpu.memory_space<vmem>>, vector<16x1xf32>
    %c0_11 = arith.constant 0 : index
    %c0_12 = arith.constant 0 : index
    %10 = vector.load %arg6[%c0_11, %c0_12] : memref<16x1xf32, #tpu.memory_space<vmem>>, vector<16x1xf32>
    %cst_13 = arith.constant dense<0.000000e+00> : vector<8xf32>
    %11 = vector.multi_reduction <add>, %8, %cst_13 [0] : vector<16x8xf32> to vector<8xf32>
    %12 = vector.shape_cast %11 : vector<8xf32> to vector<1x8xf32>
    %cst_14 = arith.constant 1.600000e+01 : f32
    %13 = vector.broadcast %cst_14 : f32 to vector<1x8xf32>
    %14 = arith.divf %12, %13 : vector<1x8xf32>
    %15 = vector.broadcast %14 : vector<1x8xf32> to vector<16x8xf32>
    %16 = arith.subf %8, %15 : vector<16x8xf32>
    %17 = vector.broadcast %14 : vector<1x8xf32> to vector<16x8xf32>
    %18 = arith.subf %8, %17 : vector<16x8xf32>
    %19 = arith.mulf %16, %18 : vector<16x8xf32>
    %cst_15 = arith.constant dense<0.000000e+00> : vector<8xf32>
    %20 = vector.multi_reduction <add>, %19, %cst_15 [0] : vector<16x8xf32> to vector<8xf32>
    %21 = vector.shape_cast %20 : vector<8xf32> to vector<1x8xf32>
    %cst_16 = arith.constant 1.600000e+01 : f32
    %22 = vector.broadcast %cst_16 : f32 to vector<1x8xf32>
    %23 = arith.divf %21, %22 : vector<1x8xf32>
    %24 = vector.broadcast %14 : vector<1x8xf32> to vector<16x8xf32>
    %25 = arith.subf %8, %24 : vector<16x8xf32>
    %cst_17 = arith.constant 9.99999993E-9 : f32
    %26 = vector.broadcast %cst_17 : f32 to vector<1x8xf32>
    %27 = arith.addf %23, %26 : vector<1x8xf32>
    %28 = math.rsqrt %27 : vector<1x8xf32>
    %29 = vector.broadcast %28 : vector<1x8xf32> to vector<16x8xf32>
    %30 = arith.mulf %25, %29 : vector<16x8xf32>
    %31 = vector.broadcast %9 : vector<16x1xf32> to vector<16x8xf32>
    %32 = arith.mulf %30, %31 : vector<16x8xf32>
    %33 = vector.broadcast %10 : vector<16x1xf32> to vector<16x8xf32>
    %34 = arith.addf %32, %33 : vector<16x8xf32>
    %c0_18 = arith.constant 0 : index
    %c0_19 = arith.constant 0 : index
    %35 = vector.load %arg7[%c0_18, %c0_19] : memref<64x16xf32, #tpu.memory_space<vmem>>, vector<64x16xf32>
    %cst_20 = arith.constant dense<0.000000e+00> : vector<64x8xf32>
    %36 = tpu.matmul %35, %3, %cst_20 {dimension_numbers = #tpu.dot_dimension_numbers<[1], [0], [0], [1], [0, 0, 1, 1], [], []>} : vector<64x16xf32>, vector<16x8xf32>, vector<64x8xf32> -> vector<64x8xf32>
    %c0_21 = arith.constant 0 : index
    %c0_22 = arith.constant 0 : index
    %37 = vector.load %arg8[%c0_21, %c0_22] : memref<64x1xf32, #tpu.memory_space<vmem>>, vector<64x1xf32>
    %38 = vector.broadcast %37 : vector<64x1xf32> to vector<64x8xf32>
    %39 = arith.addf %36, %38 : vector<64x8xf32>
    %c0_23 = arith.constant 0 : index
    %c0_24 = arith.constant 0 : index
    %40 = vector.load %arg9[%c0_23, %c0_24] : memref<64x1xf32, #tpu.memory_space<vmem>>, vector<64x1xf32>
    %c0_25 = arith.constant 0 : index
    %c0_26 = arith.constant 0 : index
    %41 = vector.load %arg10[%c0_25, %c0_26] : memref<64x1xf32, #tpu.memory_space<vmem>>, vector<64x1xf32>
    %cst_27 = arith.constant dense<0.000000e+00> : vector<8xf32>
    %42 = vector.multi_reduction <add>, %39, %cst_27 [0] : vector<64x8xf32> to vector<8xf32>
    %43 = vector.shape_cast %42 : vector<8xf32> to vector<1x8xf32>
    %cst_28 = arith.constant 6.400000e+01 : f32
    %44 = vector.broadcast %cst_28 : f32 to vector<1x8xf32>
    %45 = arith.divf %43, %44 : vector<1x8xf32>
    %46 = vector.broadcast %45 : vector<1x8xf32> to vector<64x8xf32>
    %47 = arith.subf %39, %46 : vector<64x8xf32>
    %48 = vector.broadcast %45 : vector<1x8xf32> to vector<64x8xf32>
    %49 = arith.subf %39, %48 : vector<64x8xf32>
    %50 = arith.mulf %47, %49 : vector<64x8xf32>
    %cst_29 = arith.constant dense<0.000000e+00> : vector<8xf32>
    %51 = vector.multi_reduction <add>, %50, %cst_29 [0] : vector<64x8xf32> to vector<8xf32>
    %52 = vector.shape_cast %51 : vector<8xf32> to vector<1x8xf32>
    %cst_30 = arith.constant 6.400000e+01 : f32
    %53 = vector.broadcast %cst_30 : f32 to vector<1x8xf32>
    %54 = arith.divf %52, %53 : vector<1x8xf32>
    %55 = vector.broadcast %45 : vector<1x8xf32> to vector<64x8xf32>
    %56 = arith.subf %39, %55 : vector<64x8xf32>
    %cst_31 = arith.constant 9.99999993E-9 : f32
    %57 = vector.broadcast %cst_31 : f32 to vector<1x8xf32>
    %58 = arith.addf %54, %57 : vector<1x8xf32>
    %59 = math.rsqrt %58 : vector<1x8xf32>
    %60 = vector.broadcast %59 : vector<1x8xf32> to vector<64x8xf32>
    %61 = arith.mulf %56, %60 : vector<64x8xf32>
    %62 = vector.broadcast %40 : vector<64x1xf32> to vector<64x8xf32>
    %63 = arith.mulf %61, %62 : vector<64x8xf32>
    %64 = vector.broadcast %41 : vector<64x1xf32> to vector<64x8xf32>
    %65 = arith.addf %63, %64 : vector<64x8xf32>
    %c0_32 = arith.constant 0 : index
    %c0_33 = arith.constant 0 : index
    %66 = vector.load %arg11[%c0_32, %c0_33] : memref<16x64xf32, #tpu.memory_space<vmem>>, vector<16x64xf32>
    %cst_34 = arith.constant dense<0.000000e+00> : vector<16x8xf32>
    %67 = tpu.matmul %66, %65, %cst_34 {dimension_numbers = #tpu.dot_dimension_numbers<[1], [0], [0], [1], [0, 0, 1, 1], [], []>} : vector<16x64xf32>, vector<64x8xf32>, vector<16x8xf32> -> vector<16x8xf32>
    %cst_35 = arith.constant dense<0xFF800000> : vector<16xf32>
    %68 = vector.multi_reduction <maximumf>, %67, %cst_35 [1] : vector<16x8xf32> to vector<16xf32>
    %69 = vector.shape_cast %68 : vector<16xf32> to vector<16x1xf32>
    %70 = vector.broadcast %69 : vector<16x1xf32> to vector<16x8xf32>
    %71 = arith.subf %67, %70 : vector<16x8xf32>
    %72 = math.exp %71 : vector<16x8xf32>
    %cst_36 = arith.constant dense<0.000000e+00> : vector<16xf32>
    %73 = vector.multi_reduction <add>, %72, %cst_36 [1] : vector<16x8xf32> to vector<16xf32>
    %74 = vector.shape_cast %73 : vector<16xf32> to vector<16x1xf32>
    %75 = vector.broadcast %74 : vector<16x1xf32> to vector<16x8xf32>
    %76 = arith.divf %72, %75 : vector<16x8xf32>
    %c0_37 = arith.constant 0 : index
    %c0_38 = arith.constant 0 : index
    %77 = vector.load %arg12[%c0_37, %c0_38] : memref<8x2048xf32, #tpu.memory_space<vmem>>, vector<8x2048xf32>
    %cst_39 = arith.constant dense<0.000000e+00> : vector<16x2048xf32>
    %78 = tpu.matmul %34, %77, %cst_39 {dimension_numbers = #tpu.dot_dimension_numbers<[1], [0], [0], [1], [0, 0, 1, 1], [], []>} : vector<16x8xf32>, vector<8x2048xf32>, vector<16x2048xf32> -> vector<16x2048xf32>
    %cst_40 = arith.constant dense<0.000000e+00> : vector<16x2048xf32>
    %79 = tpu.matmul %76, %77, %cst_40 {dimension_numbers = #tpu.dot_dimension_numbers<[1], [0], [0], [1], [0, 0, 1, 1], [], []>} : vector<16x8xf32>, vector<8x2048xf32>, vector<16x2048xf32> -> vector<16x2048xf32>
    %c0_41 = arith.constant 0 : index
    %c0_42 = arith.constant 0 : index
    %80 = vector.load %arg13[%c0_41, %c0_42] : memref<16x1xf32, #tpu.memory_space<vmem>>, vector<16x1xf32>
    %81 = vector.broadcast %80 : vector<16x1xf32> to vector<16x2048xf32>
    %82 = arith.mulf %1, %81 : vector<16x2048xf32>
    %c0_43 = arith.constant 0 : index
    %c0_44 = arith.constant 0 : index
    %83 = vector.load %arg14[%c0_43, %c0_44] : memref<16x1xf32, #tpu.memory_space<vmem>>, vector<16x1xf32>
    %84 = vector.broadcast %83 : vector<16x1xf32> to vector<16x2048xf32>
    %85 = arith.addf %82, %84 : vector<16x2048xf32>
    %cst_45 = arith.constant 0.000000e+00 : f32
    %86 = vector.broadcast %cst_45 : f32 to vector<16x2048xf32>
    %87 = arith.maximumf %85, %86 : vector<16x2048xf32>
    %c0_46 = arith.constant 0 : index
    %c0_47 = arith.constant 0 : index
    %88 = vector.load %arg15[%c0_46, %c0_47] : memref<16x1xf32, #tpu.memory_space<vmem>>, vector<16x1xf32>
    %89 = vector.broadcast %88 : vector<16x1xf32> to vector<16x2048xf32>
    %90 = arith.mulf %1, %89 : vector<16x2048xf32>
    %c0_48 = arith.constant 0 : index
    %c0_49 = arith.constant 0 : index
    %91 = vector.load %arg16[%c0_48, %c0_49] : memref<16x1xf32, #tpu.memory_space<vmem>>, vector<16x1xf32>
    %92 = vector.broadcast %91 : vector<16x1xf32> to vector<16x2048xf32>
    %93 = arith.addf %90, %92 : vector<16x2048xf32>
    %94 = arith.mulf %87, %78 : vector<16x2048xf32>
    %95 = arith.mulf %93, %79 : vector<16x2048xf32>
    %96 = arith.addf %94, %95 : vector<16x2048xf32>
    %c0_50 = arith.constant 0 : index
    %c0_51 = arith.constant 0 : index
    %c0_52 = arith.constant 0 : index
    %97 = vector.load %arg17[%c0_50, %c0_51, %c0_52] : memref<1x16x2048xf32, #tpu.memory_space<vmem>>, vector<1x16x2048xf32>
    %98 = vector.shape_cast %97 : vector<1x16x2048xf32> to vector<16x2048xf32>
    %99 = vector.shape_cast %96 : vector<16x2048xf32> to vector<1x16x2048xf32>
    tpu.vector_store %arg17[%c0_50, %c0_51, %c0_52], %99 {strides = array<i32>} : memref<1x16x2048xf32, #tpu.memory_space<vmem>>, vector<1x16x2048xf32>,
    return
  }
  func.func @transform_0(%arg0: i32) -> (i32, i32, i32) {
    %c0_i32 = arith.constant 0 : i32
    %c0_i32_0 = arith.constant 0 : i32
    %c0_i32_1 = arith.constant 0 : i32
    return %arg0, %c0_i32, %c0_i32_0 : i32, i32, i32
  }
  func.func @transform_1(%arg0: i32) -> (i32, i32, i32) {
    %c0_i32 = arith.constant 0 : i32
    %c0_i32_0 = arith.constant 0 : i32
    %c0_i32_1 = arith.constant 0 : i32
    return %arg0, %c0_i32, %c0_i32_0 : i32, i32, i32
  }
  func.func @transform_2(%arg0: i32) -> (i32, i32) {
    %c0_i32 = arith.constant 0 : i32
    %c0_i32_0 = arith.constant 0 : i32
    %c0_i32_1 = arith.constant 0 : i32
    return %c0_i32, %c0_i32_0 : i32, i32
  }
  func.func @transform_3(%arg0: i32) -> (i32, i32) {
    %c0_i32 = arith.constant 0 : i32
    %c0_i32_0 = arith.constant 0 : i32
    %c0_i32_1 = arith.constant 0 : i32
    return %c0_i32, %c0_i32_0 : i32, i32
  }
  func.func @transform_4(%arg0: i32) -> (i32, i32) {
    %c0_i32 = arith.constant 0 : i32
    %c0_i32_0 = arith.constant 0 : i32
    %c0_i32_1 = arith.constant 0 : i32
    return %c0_i32, %c0_i32_0 : i32, i32
  }
  func.func @transform_5(%arg0: i32) -> (i32, i32) {
    %c0_i32 = arith.constant 0 : i32
    %c0_i32_0 = arith.constant 0 : i32
    %c0_i32_1 = arith.constant 0 : i32
    return %c0_i32, %c0_i32_0 : i32, i32
  }
  func.func @transform_6(%arg0: i32) -> (i32, i32) {
    %c0_i32 = arith.constant 0 : i32
    %c0_i32_0 = arith.constant 0 : i32
    %c0_i32_1 = arith.constant 0 : i32
    return %c0_i32, %c0_i32_0 : i32, i32
  }
  func.func @transform_7(%arg0: i32) -> (i32, i32) {
    %c0_i32 = arith.constant 0 : i32
    %c0_i32_0 = arith.constant 0 : i32
    %c0_i32_1 = arith.constant 0 : i32
    return %c0_i32, %c0_i32_0 : i32, i32
  }
  func.func @transform_8(%arg0: i32) -> (i32, i32) {
    %c0_i32 = arith.constant 0 : i32
    %c0_i32_0 = arith.constant 0 : i32
    %c0_i32_1 = arith.constant 0 : i32
    return %c0_i32, %c0_i32_0 : i32, i32
  }
  func.func @transform_9(%arg0: i32) -> (i32, i32) {
    %c0_i32 = arith.constant 0 : i32
    %c0_i32_0 = arith.constant 0 : i32
    %c0_i32_1 = arith.constant 0 : i32
    return %c0_i32, %c0_i32_0 : i32, i32
  }
  func.func @transform_10(%arg0: i32) -> (i32, i32) {
    %c0_i32 = arith.constant 0 : i32
    %c0_i32_0 = arith.constant 0 : i32
    %c0_i32_1 = arith.constant 0 : i32
    return %c0_i32, %c0_i32_0 : i32, i32
  }
  func.func @transform_11(%arg0: i32) -> (i32, i32) {
    %c0_i32 = arith.constant 0 : i32
    %c0_i32_0 = arith.constant 0 : i32
    %c0_i32_1 = arith.constant 0 : i32
    return %c0_i32, %c0_i32_0 : i32, i32
  }
  func.func @transform_12(%arg0: i32) -> (i32, i32) {
    %c0_i32 = arith.constant 0 : i32
    %c0_i32_0 = arith.constant 0 : i32
    %c0_i32_1 = arith.constant 0 : i32
    return %c0_i32, %c0_i32_0 : i32, i32
  }
  func.func @transform_13(%arg0: i32) -> (i32, i32) {
    %c0_i32 = arith.constant 0 : i32
    %c0_i32_0 = arith.constant 0 : i32
    %c0_i32_1 = arith.constant 0 : i32
    return %c0_i32, %c0_i32_0 : i32, i32
  }
  func.func @transform_14(%arg0: i32) -> (i32, i32) {
    %c0_i32 = arith.constant 0 : i32
    %c0_i32_0 = arith.constant 0 : i32
    %c0_i32_1 = arith.constant 0 : i32
    return %c0_i32, %c0_i32_0 : i32, i32
  }
  func.func @transform_15(%arg0: i32) -> (i32, i32) {
    %c0_i32 = arith.constant 0 : i32
    %c0_i32_0 = arith.constant 0 : i32
    %c0_i32_1 = arith.constant 0 : i32
    return %c0_i32, %c0_i32_0 : i32, i32
  }
  func.func @transform_16(%arg0: i32) -> (i32, i32, i32) {
    %c0_i32 = arith.constant 0 : i32
    %c0_i32_0 = arith.constant 0 : i32
    %c0_i32_1 = arith.constant 0 : i32
    return %arg0, %c0_i32, %c0_i32_0 : i32, i32, i32
  }
}

</mosaic_0001>

<bundles_post_ra>
// kernel: a_call__.1
= control target key start
LH: loop header
LB: loop body
LE: loop exit
PB: predicated region body
PF: predicated region fallthrough
CT: control target
= control target key end

     0   :  { %s3136_s21 = smov 0   ;;  %s3962_s0 = inlined_call_operand.vmem [shape: f32[2,16,2048], index: 0, kind: input, shape index: {}]   ;;  %s3963_s1 = inlined_call_operand.vmem [shape: f32[2,16,8], index: 1, kind: input, shape index: {}]   ;;  %s3964_s2 = inlined_call_operand.vmem [shape: f32[16,16], index: 2, kind: input, shape index: {}]   ;;  %s3965_s3 = inlined_call_operand.vmem [shape: f32[16,1], index: 3, kind: input, shape index: {}]   ;;  %s3966_s4 = inlined_call_operand.vmem [shape: f32[16,1], index: 4, kind: input, shape index: {}]   ;;  %s3967_s5 = inlined_call_operand.vmem [shape: f32[16,1], index: 5, kind: input, shape index: {}]   ;;  %s3968_s6 = inlined_call_operand.vmem [shape: f32[64,16], index: 6, kind: input, shape index: {}]   ;;  %s3969_s7 = inlined_call_operand.vmem [shape: f32[64,1], index: 7, kind: input, shape index: {}]   ;;  %s3970_s8 = inlined_call_operand.vmem [shape: f32[64,1], index: 8, kind: input, shape index: {}]   ;;  %s3971_s9 = inlined_call_operand.vmem [shape: f32[64,1], index: 9, kind: input, shape index: {}]   ;;  %s3972_s10 = inlined_call_operand.vmem [shape: f32[16,64], index: 10, kind: input, shape index: {}]   ;;  %s3973_s11 = inlined_call_operand.vmem [shape: f32[8,2048], index: 11, kind: input, shape index: {}]   ;;  %s3974_s12 = inlined_call_operand.vmem [shape: f32[16,1], index: 12, kind: input, shape index: {}]   ;;  %s3975_s13 = inlined_call_operand.vmem [shape: f32[16,1], index: 13, kind: input, shape index: {}]   ;;  %s3976_s14 = inlined_call_operand.vmem [shape: f32[16,1], index: 14, kind: input, shape index: {}]   ;;  %s3977_s15 = inlined_call_operand.vmem [shape: f32[16,1], index: 15, kind: input, shape index: {}]   ;;  %s3978_s16 = inlined_call_operand.vmem [shape: f32[2,16,2048], index: 16, kind: output, shape index: {}]  }
   0x1   :  { %3991 = sst [smem:[#allocation20_spill]] %s3962_s0 }
   0x2 LB: > { %s2867_s22 = sadd.s32 4294967295, %s3047_s21   ;;  %p2871_p0 = scmp.ge.s32.totalorder %s3047_s21, 1  ;;  %s3047_s21 = sphi %s3136_s21, %s26_s21  }
   0x3   : > { %p472_p1 = scmp.lt.s32.totalorder %s3047_s21, 3 }
   0x5   : > { %p473_p2 = pnand %p2871_p0, %p472_p1 }
   0x7   : > { %476 = sbr.rel (%p473_p2) target bundleno = 1117 (0x45d), region = 84 }
   0xe   : > { %p527_p3 = scmp.lt.s32.totalorder %s2867_s22, 1  ;;  %vm590_vm0 = vcmask 130048   ;;  %v730_v0 = vld [vmem:[%s3968_s6] sm:$0xff]  ;;  %v3049_v1 = vmov 0   ;;  %v740_v3 = vld [vmem:[%s3969_s7 + $0x10] sm:$0xff]  ;;  %v739_v4 = vld [vmem:[%s3969_s7 + $0x8] sm:$0xff] }
   0xf   : > { %2962 = vmatprep.mubr.msk.f32.mxu1 %vm590_vm0, %v730_v0  ;;  %3027 = vset.pattern.permute.xlu0 %v3049_v1  ;;  %v738_v2 = vld [vmem:[%s3969_s7] sm:$0xff]  ;;  %v741_v5 = vld [vmem:[%s3969_s7 + $0x18] sm:$0xff]  ;;  %v743_v10 = vld [vmem:[%s3969_s7 + $0x28] sm:$0xff]  ;;  %vm1100_vm1 = vcmask 523264   ;;  %vm676_vm2 = vcmask 64512   ;;  %s3992_s17 = sld [smem:[#allocation20_spill]] }
  0x10   : > { %s4030_s22 = smov (!%p527_p3, %s2867_s22), 1  ;;  %3028 = vset.pattern.permute.xlu1 %v3049_v1  ;;  %748 = vperm.xlu0 %3027, %v738_v2   ;;  %v742_v9 = vld [vmem:[%s3969_s7 + $0x20] sm:$0xff]  ;;  %v731_v11 = vld [vmem:[%s3968_s6 + $0x8] sm:$0xff]  ;;  %v732_v12 = vld [vmem:[%s3968_s6 + $0x10] sm:$0xff] }
  0x11   : > { %s2925_s29 = sshll.u32 %s4030_s22, 4  ;;  %758 = vperm.xlu1 %3028, %v740_v3   ;;  %v744_v13 = vld [vmem:[%s3969_s7 + $0x30] sm:$0xff]  ;;  %v745_v14 = vld [vmem:[%s3969_s7 + $0x38] sm:$0xff]  ;;  %v734_v16 = vld [vmem:[%s3968_s6 + $0x20] sm:$0xff] }
  0x12   : > { %s536_s19 = scalar_lea.vmem %s3963_s1, %s2925_s29  ;;  %v733_v15 = vld [vmem:[%s3968_s6 + $0x18] sm:$0xff]  ;;  %v915_v17 = vld [vmem:[%s3970_s8] sm:$0xff]  ;;  %v916_v18 = vld [vmem:[%s3970_s8 + $0x8] sm:$0xff]  ;;  %s2924_s29 = sshll.u32 %s4030_s22, 8 }
  0x13   : > { %v574_v6 = vld [vmem:[%s536_s19] sm:$0xff]  ;;  %v575_v7 = vld [vmem:[%s536_s19 + $0x8] sm:$0xff]  ;;  %v736_v20 = vld [vmem:[%s3968_s6 + $0x30] sm:$0xff]  ;;  %s3813_s23 = scalar_lea.vmem %s3978_s16, %s2924_s29 }
  0x14   : > { %v2993_v8 = vpack.c.bf16 %v575_v7, %v574_v6  ;;  %753 = vperm.xlu0 %3027, %v739_v4   ;;  %v735_v19 = vld [vmem:[%s3968_s6 + $0x28] sm:$0xff]  ;;  %v923_v21 = vld [vmem:[%s3971_s9] sm:$0xff]  ;;  %v737_v23 = vld [vmem:[%s3968_s6 + $0x38] sm:$0xff] }
  0x15   : > { %763 = vperm.xlu1 %3028, %v741_v5   ;;  %v924_v22 = vld [vmem:[%s3971_s9 + $0x8] sm:$0xff]  ;;  %v917_v24 = vld [vmem:[%s3970_s8 + $0x10] sm:$0xff]  ;;  %v918_v25 = vld [vmem:[%s3970_s8 + $0x18] sm:$0xff]  ;;  %s3520_s18 = scalar_lea.vmem %s3992_s17, %s2924_s29 }
  0x16   : > { %2998 = vmatprep.subr.bf16.mxu1 %v2993_v8  ;;  %2994 = vmatprep.subr.bf16.mxu0 %v2993_v8  ;;  %v925_v26 = vld [vmem:[%s3971_s9 + $0x10] sm:$0xff]  ;;  %v926_v27 = vld [vmem:[%s3971_s9 + $0x18] sm:$0xff]  ;;  %v919_v28 = vld [vmem:[%s3970_s8 + $0x20] sm:$0xff] }
  0x17   : > { %3000 = vmatpush3.bf16.msra.mxu1 %v2993_v8  ;;  %2996 = vmatpush3.bf16.msra.mxu0 %v2993_v8  ;;  %v920_v29 = vld [vmem:[%s3970_s8 + $0x28] sm:$0xff]  ;;  %v927_v30 = vld [vmem:[%s3971_s9 + $0x20] sm:$0xff]  ;;  %v921_v32 = vld [vmem:[%s3970_s8 + $0x30] sm:$0xff] }
  0x18   : > { %768 = vperm.xlu0 %3027, %v742_v9   ;;  %v928_v31 = vld [vmem:[%s3971_s9 + $0x28] sm:$0xff]  ;;  %v922_v33 = vld [vmem:[%s3970_s8 + $0x38] sm:$0xff]  ;;  %v929_v34 = vld [vmem:[%s3971_s9 + $0x30] sm:$0xff] }
  0x19   : > { %773 = vperm.xlu1 %3028, %v743_v10   ;;  %v930_v35 = vld [vmem:[%s3971_s9 + $0x38] sm:$0xff]  ;;  %v576_v36 = vld [vmem:[%s3964_s2] sm:$0xff]  ;;  %v577_v37 = vld [vmem:[%s3964_s2 + $0x8] sm:$0xff] }
  0x1a   : > { %2963 = vmatmul.mubr.msk.f32.vlgmr.msra.gmra.mrb[0].mxu1 %vm590_vm0, %v731_v11  ;;  %2955 = vmatprep.mubr.msk.f32.mxu0 %vm590_vm0, %v576_v36  ;;  %v1098_v38 = vld [vmem:[%s3972_s10] sm:$0xff] }
  0x1b   : > { %2965 = vmatprep.mubr.msk.f32.mxu1 %vm590_vm0, %v732_v12  ;;  %2956 = vmatmul.mubr.msk.f32.vlgmr.msra.gmra.mrb[0].mxu0 %vm590_vm0, %v577_v37 }
  0x1c   : > { %778 = vperm.xlu0 %3027, %v744_v13   ;;  %2990 = vmatprep.mubr.msk.f32.mxu0 %vm1100_vm1, %v1098_v38 }
  0x1d   : > { %783 = vperm.xlu1 %3028, %v745_v14  }
  0x1e   : > { %2966 = vmatmul.mubr.msk.f32.gmra.mrb[2].mxu1 %vm590_vm0, %v733_v15 }
  0x1f   : > { %2968 = vmatprep.mubr.msk.f32.mxu1 %vm590_vm0, %v734_v16 }
  0x20   : > { %1004 = vperm.xlu0 %3027, %v915_v17  }
  0x21   : > { %1009 = vperm.xlu1 %3028, %v916_v18  }
  0x22   : > { %2969 = vmatmul.mubr.msk.f32.gmra.mrb[4].mxu1 %vm590_vm0, %v735_v19 }
  0x23   : > { %2971 = vmatprep.mubr.msk.f32.mxu1 %vm590_vm0, %v736_v20 }
  0x24   : > { %1052 = vperm.xlu0 %3027, %v923_v21  }
  0x25   : > { %1057 = vperm.xlu1 %3028, %v924_v22  }
  0x26   : > { %2972 = vmatmul.mubr.msk.f32.gmra.mrb[6].mxu1 %vm590_vm0, %v737_v23 }
  0x28   : > { %1014 = vperm.xlu0 %3027, %v917_v24  }
  0x29   : > { %1019 = vperm.xlu1 %3028, %v918_v25  }
  0x2c   : > { %1062 = vperm.xlu0 %3027, %v925_v26  }
  0x2d   : > { %1067 = vperm.xlu1 %3028, %v926_v27  }
  0x30   : > { %1024 = vperm.xlu0 %3027, %v919_v28  }
  0x31   : > { %1029 = vperm.xlu1 %3028, %v920_v29  }
  0x34   : > { %1072 = vperm.xlu0 %3027, %v927_v30  }
  0x35   : > { %1077 = vperm.xlu1 %3028, %v928_v31  }
  0x38   : > { %1034 = vperm.xlu0 %3027, %v921_v32  }
  0x39   : > { %1039 = vperm.xlu1 %3028, %v922_v33  }
  0x3c   : > { %1082 = vperm.xlu0 %3027, %v929_v34  }
  0x3d   : > { %1087 = vperm.xlu1 %3028, %v930_v35  }
  0x8f   : > { %v749_v39 = vpop.permute.xlu0 %748 }
  0x90   : > { %v759_v40 = vpop.permute.xlu1 %758 }
  0x93   : > { %v754_v41 = vpop.permute.xlu0 %753 }
  0x94   : > { %v764_v43 = vpop.permute.xlu1 %763 }
  0x97   : > { %v769_v52 = vpop.permute.xlu0 %768 }
  0x98   : > { %v774_v55 = vpop.permute.xlu1 %773 }
  0x9b   : > { %v779_v0 = vpop.permute.xlu0 %778 }
  0x9c   : > { %v784_v3 = vpop.permute.xlu1 %783 }
  0x9f   : > { %v1005_v38 = vpop.permute.xlu0 %1004 }
  0xed   : > { %v2964_v42 = vpop.f32.mrb[0].mxu1 }
  0xee   : > { %v882_v44 = vadd.f32 %v2964_v42, %v754_v41  ;;  %v876_v45 = vpop.f32.mrb[1].mxu1 }
  0xef   : > { %v877_v46 = vadd.f32 %v876_v45, %v749_v39 }
  0xf0   : > { %v932_v47 = vsel %vm676_vm2, %v882_v44, 0.0 }
  0xf1   : > { %v931_v48 = vsel %vm676_vm2, %v877_v46, 0.0  ;;  %v2967_v49 = vpop.f32.mrb[2].mxu1 }
  0xf2   : > { %v933_v50 = vadd.f32 %v932_v47, %v931_v48  ;;  %v886_v51 = vpop.f32.mrb[3].mxu1  ;;  %v892_v53 = vadd.f32 %v2967_v49, %v764_v43  ;;  %v1053_v49 = vpop.permute.xlu0 %1052 }
  0xf3   : > { %v887_v54 = vadd.f32 %v886_v51, %v759_v40  ;;  %v1010_v40 = vpop.permute.xlu1 %1009 }
  0xf4   : > { %v936_v60 = vsel %vm676_vm2, %v892_v53, 0.0 }
  0xf5   : > { %v934_v56 = vsel %vm676_vm2, %v887_v54, 0.0  ;;  %v2970_v57 = vpop.f32.mrb[4].mxu1 }
  0xf6   : > { %v935_v58 = vadd.f32 %v934_v56, %v933_v50  ;;  %v896_v59 = vpop.f32.mrb[5].mxu1  ;;  %v902_v61 = vadd.f32 %v2970_v57, %v774_v55  ;;  %v1015_v56 = vpop.permute.xlu0 %1014 }
  0xf7   : > { %v897_v62 = vadd.f32 %v896_v59, %v769_v52  ;;  %v1058_v51 = vpop.permute.xlu1 %1057 }
  0xf8   : > { %v937_v63 = vadd.f32 %v936_v60, %v935_v58  ;;  %v940_v6 = vsel %vm676_vm2, %v902_v61, 0.0 }
  0xf9   : > { %v938_v1 = vsel %vm676_vm2, %v897_v62, 0.0  ;;  %v2973_v2 = vpop.f32.mrb[6].mxu1 }
  0xfa   : > { %v939_v4 = vadd.f32 %v938_v1, %v937_v63  ;;  %v906_v5 = vpop.f32.mrb[7].mxu1  ;;  %v912_v7 = vadd.f32 %v2973_v2, %v784_v3 }
  0xfb   : > { %v907_v8 = vadd.f32 %v906_v5, %v779_v0  ;;  %v1020_v58 = vpop.permute.xlu1 %1019 }
  0xfc   : > { %v941_v9 = vadd.f32 %v940_v6, %v939_v4  ;;  %v944_v12 = vsel %vm676_vm2, %v912_v7, 0.0 }
  0xfd   : > { %v942_v10 = vsel %vm676_vm2, %v907_v8, 0.0 }
  0xfe   : > { %v943_v11 = vadd.f32 %v942_v10, %v941_v9 }
  0xff   : > { %v1068_v63 = vpop.permute.xlu1 %1067 }
 0x100   : > { %v945_v13 = vadd.f32 %v944_v12, %v943_v11 }
 0x102   : > { %v946_v14 = vrot.slane %v945_v13, 4 }
 0x103   : > { %v1030_v4 = vpop.permute.xlu1 %1029 }
 0x104   : > { %v947_v15 = vadd.f32 %v946_v14, %v945_v13 }
 0x106   : > { %v948_v16 = vrot.slane %v947_v15, 2 }
 0x108   : > { %v949_v17 = vadd.f32 %v948_v16, %v947_v15 }
 0x10a   : > { %v950_v18 = vrot.slane %v949_v17, 1 }
 0x10c   : > { %v951_v19 = vadd.f32 %v950_v18, %v949_v17 }
 0x10e   : > { %v953_v20 = vmul.f32 0.015625, %v951_v19 }
 0x110   : > { %v954_v21 = vsub.f32 %v877_v46, %v953_v20  ;;  %v955_v22 = vsub.f32 %v882_v44, %v953_v20  ;;  %v956_v23 = vsub.f32 %v887_v54, %v953_v20  ;;  %v957_v24 = vsub.f32 %v892_v53, %v953_v20 }
 0x111   : > { %v958_v25 = vsub.f32 %v897_v62, %v953_v20  ;;  %v959_v26 = vsub.f32 %v902_v61, %v953_v20  ;;  %v960_v27 = vsub.f32 %v907_v8, %v953_v20  ;;  %v961_v28 = vsub.f32 %v912_v7, %v953_v20  ;;  %v1063_v61 = vpop.permute.xlu0 %1062  ;;  %v1078_v7 = vpop.permute.xlu1 %1077 }
 0x112   : > { %v962_v29 = vmul.f32 %v954_v21, %v954_v21  ;;  %v963_v30 = vmul.f32 %v955_v22, %v955_v22  ;;  %v964_v31 = vmul.f32 %v956_v23, %v956_v23  ;;  %v965_v32 = vmul.f32 %v957_v24, %v957_v24 }
 0x113   : > { %v966_v36 = vmul.f32 %v958_v25, %v958_v25  ;;  %v967_v41 = vmul.f32 %v959_v26, %v959_v26  ;;  %v968_v44 = vmul.f32 %v960_v27, %v960_v27  ;;  %v969_v47 = vmul.f32 %v961_v28, %v961_v28 }
 0x114   : > { %v970_v33 = vsel %vm676_vm2, %v962_v29, 0.0  ;;  %v971_v34 = vsel %vm676_vm2, %v963_v30, 0.0  ;;  %v973_v37 = vsel %vm676_vm2, %v964_v31, 0.0  ;;  %v975_v42 = vsel %vm676_vm2, %v965_v32, 0.0 }
 0x115   : > { %v972_v35 = vadd.f32 %v971_v34, %v970_v33  ;;  %v977_v45 = vsel %vm676_vm2, %v966_v36, 0.0  ;;  %v979_v48 = vsel %vm676_vm2, %v967_v41, 0.0  ;;  %v981_v52 = vsel %vm676_vm2, %v968_v44, 0.0  ;;  %v1025_v2 = vpop.permute.xlu0 %1024  ;;  %v1040_v9 = vpop.permute.xlu1 %1039 }
 0x116   : > { %v983_v54 = vsel %vm676_vm2, %v969_v47, 0.0 }
 0x117   : > { %v974_v39 = vadd.f32 %v973_v37, %v972_v35 }
 0x119   : > { %v976_v43 = vadd.f32 %v975_v42, %v974_v39  ;;  %v1073_v6 = vpop.permute.xlu0 %1072  ;;  %v1088_v36 = vpop.permute.xlu1 %1087 }
 0x11a   : > { %v2957_v42 = vpop.f32.mrb[0].mxu0 }
 0x11b   : > { %v978_v46 = vadd.f32 %v977_v45, %v976_v43  ;;  %v663_v43 = vpop.f32.mrb[1].mxu0 }
 0x11d   : > { %v980_v50 = vadd.f32 %v979_v48, %v978_v46  ;;  %v1035_v8 = vpop.permute.xlu0 %1034  ;;  %v579_v48 = vld [vmem:[%s3965_s3 + $0x8] sm:$0xff] }
 0x11f   : > { %v982_v53 = vadd.f32 %v981_v52, %v980_v50  ;;  %v578_v50 = vld [vmem:[%s3965_s3] sm:$0xff] }
 0x120   : > { %v672_v52 = vld [vmem:[%s3966_s4] sm:$0xff] }
 0x121   : > { %v984_v55 = vadd.f32 %v983_v54, %v982_v53  ;;  %v1083_v31 = vpop.permute.xlu0 %1082  ;;  %v673_v53 = vld [vmem:[%s3966_s4 + $0x8] sm:$0xff] }
 0x122   : > { %v3309_v54 = vld [vmem:[%s3973_s11 + $0x8] sm:$0xff] }
 0x123   : > { %v985_v57 = vrot.slane %v984_v55, 4  ;;  %1226 = vmatprep.subr.mxu1 %v3309_v54 }
 0x125   : > { %v986_v59 = vadd.f32 %v985_v57, %v984_v55  ;;  %v3314_v55 = vld [vmem:[%s3973_s11 + $0x18] sm:$0xff]  ;;  %v3326_v57 = vld [vmem:[%s3973_s11 + $0x10] sm:$0xff] }
 0x127   : > { %v987_v60 = vrot.slane %v986_v59, 2 }
 0x129   : > { %v988_v62 = vadd.f32 %v987_v60, %v986_v59  ;;  %v3335_v59 = vld [vmem:[%s3973_s11 + $0x28] sm:$0xff]  ;;  %v3340_v60 = vld [vmem:[%s3973_s11 + $0x38] sm:$0xff] }
 0x12b   : > { %v989_v0 = vrot.slane %v988_v62, 1 }
 0x12d   : > { %v990_v1 = vadd.f32 %v989_v0, %v988_v62 }
 0x12f   : > { %v991_v3 = vmul.f32 0.015625, %v990_v1 }
 0x131   : > { %v992_v5 = vadd.f32 1e-08, %v991_v3 }
 0x133   : > { %3029 = vrsqrt.f32 %v992_v5 }
 0x13d   : > { %v3030_v10 = vpop.eup %3029 }
 0x13e   : > { %v1000_v11 = vmul.f32 %v3030_v10, %v960_v27  ;;  %v994_v12 = vmul.f32 %v3030_v10, %v954_v21  ;;  %v995_v13 = vmul.f32 %v3030_v10, %v955_v22  ;;  %v996_v14 = vmul.f32 %v3030_v10, %v956_v23 }
 0x13f   : > { %v997_v15 = vmul.f32 %v3030_v10, %v957_v24  ;;  %v998_v16 = vmul.f32 %v3030_v10, %v958_v25  ;;  %v999_v17 = vmul.f32 %v3030_v10, %v959_v26  ;;  %v1001_v18 = vmul.f32 %v3030_v10, %v961_v28 }
 0x140   : > { %v1048_v19 = vmul.f32 %v1035_v8, %v1000_v11  ;;  %v1042_v20 = vmul.f32 %v1005_v38, %v994_v12  ;;  %v1043_v29 = vmul.f32 %v1010_v40, %v995_v13  ;;  %v1044_v30 = vmul.f32 %v1015_v56, %v996_v14  ;;  %v1099_v40 = vld [vmem:[%s3972_s10 + $0x8] sm:$0xff]  ;;  %v3319_v56 = vld [vmem:[%s3973_s11] sm:$0xff] }
 0x141   : > { %v1045_v32 = vmul.f32 %v1020_v58, %v997_v15  ;;  %v1046_v33 = vmul.f32 %v1025_v2, %v998_v16  ;;  %v1047_v34 = vmul.f32 %v1030_v4, %v999_v17  ;;  %v1049_v35 = vmul.f32 %v1040_v9, %v1001_v18  ;;  %1227 = vmatpush1.msra.mxu1 %v3319_v56 }
 0x142   : > { %v1090_v37 = vadd.f32 %v1053_v49, %v1042_v20  ;;  %v1091_v39 = vadd.f32 %v1058_v51, %v1043_v29  ;;  %v1092_v27 = vadd.f32 %v1063_v61, %v1044_v30  ;;  %v1096_v21 = vadd.f32 %v1083_v31, %v1048_v19  ;;  %v674_v49 = vld [vmem:[%s3967_s5] sm:$0xff]  ;;  %v675_v51 = vld [vmem:[%s3967_s5 + $0x8] sm:$0xff]  ;;  %1380 = vmatprep.subr.mxu1 %v3335_v59 }
 0x143   : > { %v1093_v22 = vadd.f32 %v1068_v63, %v1045_v32  ;;  %v1094_v23 = vadd.f32 %v1073_v6, %v1046_v33  ;;  %v1095_v24 = vadd.f32 %v1078_v7, %v1047_v34  ;;  %v1097_v25 = vadd.f32 %v1088_v36, %v1049_v35  ;;  %v2465_v33 = vld [vmem:[%s3974_s12 + $0x8] sm:$0xff] }
 0x144   : > { %v3001_v26 = vpack.c.bf16 %v1091_v39, %v1090_v37  ;;  %v3050_v58 = vmov 0.0   ;;  %v2509_v37 = vld [vmem:[%s3975_s13 + $0x8] sm:$0xff] }
 0x145   : > { %v3005_v28 = vpack.c.bf16 %v1093_v22, %v1092_v27  ;;  %v3009_v41 = vpack.c.bf16 %v1095_v24, %v1094_v23  ;;  %v3013_v38 = vpack.c.bf16 %v1097_v25, %v1096_v21  ;;  %1290 = vmatprep.mubr.f32.mxu1 %v3050_v58  ;;  %v2464_v27 = vld [vmem:[%s3974_s12] sm:$0xff]  ;;  %v2585_v22 = vld [vmem:[%s3976_s14 + $0x8] sm:$0xff] }
 0x146   : > { %3002 = vmatprep.subr.bf16.mxu0 %v3001_v26  ;;  %v2508_v24 = vld [vmem:[%s3975_s13] sm:$0xff] }
 0x147   : > { %3004 = vmatpush3.bf16.msra.mxu0 %v3001_v26  ;;  %v2629_v26 = vld [vmem:[%s3977_s15 + $0x8] sm:$0xff] }
 0x148   : > { %3006 = vmatprep.subr.bf16.mxu0 %v3005_v28 }
 0x14b   : > { %3008 = vmatpush3.bf16.msra.mxu0 %v3005_v28 }
 0x14c   : > { %3010 = vmatprep.subr.bf16.mxu0 %v3009_v41 }
 0x14f   : > { %3012 = vmatpush3.bf16.msra.mxu0 %v3009_v41  ;;  %v2584_v41 = vld [vmem:[%s3976_s14] sm:$0xff] }
 0x150   : > { %3014 = vmatprep.subr.bf16.mxu0 %v3013_v38 }
 0x153   : > { %3016 = vmatpush3.bf16.msra.mxu0 %v3013_v38 }
 0x154   : > { %1303 = vmatprep.subr.mxu0 %v3314_v55 }
 0x156   : > { %2991 = vmatmul.mubr.msk.f32.vlgmr.msra.gmra.mrb[2].mxu0 %vm1100_vm1, %v1099_v40 }
 0x157   : > { %1304 = vmatpush1.msra.mxu0 %v3326_v57  ;;  %1367 = vmatprep.mubr.f32.mxu0 %v3050_v58 }
 0x158   : > { %1457 = vmatprep.subr.mxu0 %v3340_v60 }
 0x229   : > { %v2992_v44 = vpop.f32.mrb[2].mxu0 }
 0x22a   : > { %v1173_v45 = vpop.f32.mrb[3].mxu0  ;;  %v1185_v46 = vsel %vm676_vm2, %v2992_v44, -inf }
 0x22b   : > { %1186 = vmax.xlane.f32.xlu1 %v1185_v46  ;;  %v1182_v47 = vsel %vm676_vm2, %v1173_v45, -inf }
 0x22c   : > { %1183 = vmax.xlane.f32.xlu0 %v1182_v47 }
 0x23c   : > { %587 = vperm.xlu1 %3028, %v579_v48  }
 0x240   : > { %720 = vperm.xlu1 %3028, %v674_v49  }
 0x242   : > { %582 = vperm.xlu0 %3027, %v578_v50  }
 0x244   : > { %725 = vperm.xlu1 %3028, %v675_v51  }
 0x246   : > { %708 = vperm.xlu0 %3027, %v672_v52  }
 0x24a   : > { %713 = vperm.xlu0 %3027, %v673_v53   ;;  %v3383_v53 = vld [vmem:[%s3973_s11 + $0x20] sm:$0xff] }
 0x2b8   : > { %v1187_v61 = vpop.xlane.xlu1 %1186 }
 0x2b9   : > { %v1189_v62 = vsub.f32 %v2992_v44, %v1187_v61  ;;  %v1184_v63 = vpop.xlane.xlu0 %1183  ;;  %v3388_v61 = vld [vmem:[%s3973_s11 + $0x30] sm:$0xff] }
 0x2ba   : > { %v1188_v0 = vsub.f32 %v1173_v45, %v1184_v63  ;;  %v3400_v63 = vld [vmem:[%s3973_s11 + $0x58] sm:$0xff] }
 0x2bb   : > { %v1192_v1 = vmul.f32 1.442695, %v1189_v62  ;;  %v3395_v62 = vld [vmem:[%s3973_s11 + $0x48] sm:$0xff] }
 0x2bc   : > { %v1190_v2 = vmul.f32 1.442695, %v1188_v0  ;;  %v588_v3 = vpop.permute.xlu1 %587 }
 0x2bd   : > { %3031 = vpow2.f32 %v1192_v1  ;;  %v669_v4 = vadd.f32 %v2957_v42, %v588_v3  ;;  %v2628_v42 = vld [vmem:[%s3977_s15] sm:$0xff]  ;;  %v3420_v3 = vld [vmem:[%s3973_s11 + $0x50] sm:$0xff] }
 0x2be   : > { %3033 = vpow2.f32 %v1190_v2  ;;  %v3415_v2 = vld [vmem:[%s3973_s11 + $0x40] sm:$0xff] }
 0x2bf   : > { %v678_v7 = vsel %vm676_vm2, %v669_v4, 0.0 }
 0x2c0   : > { %v721_v48 = vpop.permute.xlu1 %720 }
 0x2c1   : > { %v583_v5 = vpop.permute.xlu0 %582 }
 0x2c2   : > { %v664_v6 = vadd.f32 %v663_v43, %v583_v5  ;;  %v3432_v5 = vld [vmem:[%s3973_s11 + $0x78] sm:$0xff] }
 0x2c4   : > { %v677_v8 = vsel %vm676_vm2, %v664_v6, 0.0  ;;  %v726_v0 = vpop.permute.xlu1 %725 }
 0x2c5   : > { %v679_v9 = vadd.f32 %v678_v7, %v677_v8  ;;  %v709_v44 = vpop.permute.xlu0 %708  ;;  %v1218_v7 = vld [vmem:[%s3973_s11 + $0x70] sm:$0xff] }
 0x2c7   : > { %v3346_v10 = vpop.eup %3031  ;;  %v680_v11 = vrot.slane %v679_v9, 4 }
 0x2c8   : > { %v3348_v12 = vpop.eup %3033  ;;  %v1197_v13 = vsel %vm676_vm2, %v3346_v10, 0.0 }
 0x2c9   : > { %v681_v14 = vadd.f32 %v680_v11, %v679_v9  ;;  %1198 = vadd.xlane.f32.xlu1 %v1197_v13  ;;  %v1194_v15 = vsel %vm676_vm2, %v3348_v12, 0.0  ;;  %v714_v50 = vpop.permute.xlu0 %713  ;;  %v3525_v9 = vld [vmem:[%s3520_s18] sm:$0xff]  ;;  %v3531_v11 = vld [vmem:[%s3520_s18 + $0x8] sm:$0xff] }
 0x2ca   : > { %1195 = vadd.xlane.f32.xlu0 %v1194_v15 }
 0x2cb   : > { %v682_v16 = vrot.slane %v681_v14, 2 }
 0x2cd   : > { %v683_v17 = vadd.f32 %v682_v16, %v681_v14 }
 0x2cf   : > { %v684_v18 = vrot.slane %v683_v17, 1 }
 0x2d1   : > { %v685_v19 = vadd.f32 %v684_v18, %v683_v17  ;;  %v3547_v18 = vld [vmem:[%s3520_s18 + $0x80] sm:$0xff] }
 0x2d3   : > { %v687_v20 = vmul.f32 0.0625, %v685_v19  ;;  %v3550_v19 = vld [vmem:[%s3520_s18 + $0x90] sm:$0xff] }
 0x2d5   : > { %v688_v29 = vsub.f32 %v664_v6, %v687_v20  ;;  %v689_v30 = vsub.f32 %v669_v4, %v687_v20  ;;  %v3427_v4 = vld [vmem:[%s3973_s11 + $0x68] sm:$0xff]  ;;  %v1216_v6 = vld [vmem:[%s3973_s11 + $0x60] sm:$0xff] }
 0x2d7   : > { %v690_v31 = vmul.f32 %v688_v29, %v688_v29  ;;  %v691_v32 = vmul.f32 %v689_v30, %v689_v30 }
 0x2d9   : > { %v692_v34 = vsel %vm676_vm2, %v690_v31, 0.0  ;;  %v693_v35 = vsel %vm676_vm2, %v691_v32, 0.0  ;;  %v3558_v31 = vld [vmem:[%s3520_s18 + $0x98] sm:$0xff] }
 0x2da   : > { %v694_v36 = vadd.f32 %v693_v35, %v692_v34  ;;  %2473 = vperm.xlu1 %3028, %v2465_v33  }
 0x2dc   : > { %v695_v39 = vrot.slane %v694_v36, 4 }
 0x2de   : > { %v696_v21 = vadd.f32 %v695_v39, %v694_v36  ;;  %2517 = vperm.xlu1 %3028, %v2509_v37  }
 0x2e0   : > { %v697_v23 = vrot.slane %v696_v21, 2  ;;  %2468 = vperm.xlu0 %3027, %v2464_v27   ;;  %v3573_v27 = vld [vmem:[%s3520_s18 + $0x20] sm:$0xff] }
 0x2e2   : > { %v698_v25 = vadd.f32 %v697_v23, %v696_v21  ;;  %2593 = vperm.xlu1 %3028, %v2585_v22   ;;  %v3576_v21 = vld [vmem:[%s3520_s18 + $0x30] sm:$0xff] }
 0x2e4   : > { %v699_v28 = vrot.slane %v698_v25, 1  ;;  %2512 = vperm.xlu0 %3027, %v2508_v24  }
 0x2e6   : > { %v700_v38 = vadd.f32 %v699_v28, %v698_v25  ;;  %2637 = vperm.xlu1 %3028, %v2629_v26   ;;  %v3581_v26 = vld [vmem:[%s3520_s18 + $0x28] sm:$0xff]  ;;  %v3584_v28 = vld [vmem:[%s3520_s18 + $0x38] sm:$0xff] }
 0x2e8   : > { %v701_v40 = vmul.f32 0.0625, %v700_v38  ;;  %2588 = vperm.xlu0 %3027, %v2584_v41  }
 0x2ea   : > { %v702_v43 = vadd.f32 1e-08, %v701_v40 }
 0x2ec   : > { %3035 = vrsqrt.f32 %v702_v43  ;;  %2632 = vperm.xlu0 %3027, %v2628_v42  }
 0x2f6   : > { %v3036_v45 = vpop.eup %3035 }
 0x2f7   : > { %v704_v46 = vmul.f32 %v3036_v45, %v688_v29  ;;  %v705_v47 = vmul.f32 %v3036_v45, %v689_v30  ;;  %v3555_v30 = vld [vmem:[%s3520_s18 + $0x88] sm:$0xff] }
 0x2f9   : > { %v716_v49 = vmul.f32 %v709_v44, %v704_v46  ;;  %v717_v52 = vmul.f32 %v714_v50, %v705_v47 }
 0x2fb   : > { %v728_v51 = vadd.f32 %v721_v48, %v716_v49  ;;  %v729_v1 = vadd.f32 %v726_v0, %v717_v52 }
 0x2fd   : > { %2890 = vmatmul.mubr.msk.f32.vlgmr.msra.gmra.mrb[8].mxu1 %vm676_vm2, %v728_v51  ;;  %2892 = vmatmul.mubr.msk.f32.vlgmr.msra.gmra.mrb[4].mxu0 %vm676_vm2, %v728_v51 }
 0x2fe   : > { %1296 = vmatprep.mubr.f32.mxu1 %v3050_v58  ;;  %1373 = vmatprep.mubr.f32.mxu0 %v3050_v58 }
 0x2ff   : > { %1381 = vmatpush1.msra.mxu1 %v3383_v53  ;;  %1458 = vmatpush1.msra.mxu0 %v3388_v61 }
 0x300   : > { %1534 = vmatprep.subr.mxu1 %v3395_v62  ;;  %1611 = vmatprep.subr.mxu0 %v3400_v63 }
 0x301   : > { %2891 = vmatmul.mubr.msk.f32.gmra.mrb[10].mxu1 %vm676_vm2, %v729_v1  ;;  %2893 = vmatmul.mubr.msk.f32.gmra.mrb[6].mxu0 %vm676_vm2, %v729_v1 }
 0x302   : > { %1444 = vmatprep.mubr.f32.mxu1 %v3050_v58  ;;  %1521 = vmatprep.mubr.f32.mxu0 %v3050_v58 }
 0x305   : > { %2894 = vmatmul.mubr.msk.f32.vlgmr.msra.gmra.mrb[12].mxu1 %vm676_vm2, %v728_v51  ;;  %2896 = vmatmul.mubr.msk.f32.vlgmr.msra.gmra.mrb[8].mxu0 %vm676_vm2, %v728_v51 }
 0x306   : > { %1450 = vmatprep.mubr.f32.mxu1 %v3050_v58  ;;  %1527 = vmatprep.mubr.f32.mxu0 %v3050_v58 }
 0x307   : > { %1535 = vmatpush1.msra.mxu1 %v3415_v2  ;;  %1612 = vmatpush1.msra.mxu0 %v3420_v3 }
 0x308   : > { %1688 = vmatprep.subr.mxu1 %v3427_v4  ;;  %1765 = vmatprep.subr.mxu0 %v3432_v5 }
 0x309   : > { %2895 = vmatmul.mubr.msk.f32.gmra.mrb[14].mxu1 %vm676_vm2, %v729_v1  ;;  %2897 = vmatmul.mubr.msk.f32.gmra.mrb[10].mxu0 %vm676_vm2, %v729_v1 }
 0x30a   : > { %1598 = vmatprep.mubr.f32.mxu1 %v3050_v58  ;;  %1675 = vmatprep.mubr.f32.mxu0 %v3050_v58 }
 0x30d   : > { %2898 = vmatmul.mubr.msk.f32.vlgmr.msra.gmra.mrb[16].mxu1 %vm676_vm2, %v728_v51  ;;  %2900 = vmatmul.mubr.msk.f32.vlgmr.msra.gmra.mrb[12].mxu0 %vm676_vm2, %v728_v51 }
 0x30e   : > { %1604 = vmatprep.mubr.f32.mxu1 %v3050_v58  ;;  %1681 = vmatprep.mubr.f32.mxu0 %v3050_v58 }
 0x30f   : > { %1689 = vmatpush1.msra.mxu1 %v1216_v6  ;;  %1766 = vmatpush1.msra.mxu0 %v1218_v7 }
 0x310   : > { %1848 = vmatprep.subr.mxu1 %v3309_v54  ;;  %1925 = vmatprep.subr.mxu0 %v3314_v55 }
 0x311   : > { %2899 = vmatmul.mubr.msk.f32.gmra.mrb[18].mxu1 %vm676_vm2, %v729_v1  ;;  %2901 = vmatmul.mubr.msk.f32.gmra.mrb[14].mxu0 %vm676_vm2, %v729_v1 }
 0x312   : > { %1752 = vmatprep.mubr.f32.mxu1 %v3050_v58  ;;  %1829 = vmatprep.mubr.f32.mxu0 %v3050_v58 }
 0x315   : > { %2902 = vmatmul.mubr.msk.f32.vlgmr.msra.gmra.mrb[20].mxu1 %vm676_vm2, %v728_v51  ;;  %2904 = vmatmul.mubr.msk.f32.vlgmr.msra.gmra.mrb[16].mxu0 %vm676_vm2, %v728_v51 }
 0x316   : > { %1758 = vmatprep.mubr.f32.mxu1 %v3050_v58  ;;  %1835 = vmatprep.mubr.f32.mxu0 %v3050_v58 }
 0x317   : > { %1849 = vmatpush1.msra.mxu1 %v3319_v56  ;;  %1926 = vmatpush1.msra.mxu0 %v3326_v57 }
 0x318   : > { %2002 = vmatprep.subr.mxu1 %v3335_v59  ;;  %2079 = vmatprep.subr.mxu0 %v3340_v60 }
 0x319   : > { %2903 = vmatmul.mubr.msk.f32.gmra.mrb[22].mxu1 %vm676_vm2, %v729_v1  ;;  %2905 = vmatmul.mubr.msk.f32.gmra.mrb[18].mxu0 %vm676_vm2, %v729_v1 }
 0x31a   : > { %1912 = vmatprep.mubr.f32.mxu1 %v3050_v58  ;;  %1989 = vmatprep.mubr.f32.mxu0 %v3050_v58 }
 0x356   : > { %v1199_v54 = vpop.xlane.xlu1 %1198 }
 0x357   : > { %v1196_v55 = vpop.xlane.xlu0 %1195 }
 0x358   : > { %3037 = vrcp.f32 %v1196_v55 }
 0x359   : > { %3039 = vrcp.f32 %v1199_v54 }
 0x35f   : > { %v3513_v60 = vpop.permute.xlu0 %2468 }
 0x360   : > { %v2476_v14 = vmul.f32 %v3513_v60, %v3525_v9  ;;  %v2477_v16 = vmul.f32 %v3513_v60, %v3531_v11  ;;  %v2480_v49 = vmul.f32 %v3513_v60, %v3573_v27  ;;  %v2482_v50 = vmul.f32 %v3513_v60, %v3576_v21 }
 0x362   : > { %v3038_v8 = vpop.eup %3037 }
 0x363   : > { %v1201_v56 = vmul.f32 %v3038_v8, %v3348_v12  ;;  %v3040_v57 = vpop.eup %3039  ;;  %v3534_v12 = vld [vmem:[%s3520_s18 + $0x18] sm:$0xff]  ;;  %v3536_v13 = vpop.permute.xlu0 %2512 }
 0x364   : > { %v1203_v59 = vmul.f32 %v3040_v57, %v3346_v10  ;;  %v3528_v10 = vld [vmem:[%s3520_s18 + $0x10] sm:$0xff]  ;;  %v2479_v17 = vmul.f32 %v3513_v60, %v3534_v12  ;;  %v2520_v20 = vadd.f32 %v3536_v13, %v2476_v14  ;;  %v2521_v33 = vadd.f32 %v3536_v13, %v2477_v16 }
 0x365   : > { %2906 = vmatmul.mubr.msk.f32.vlgmr.msra.gmra.mrb[24].mxu1 %vm676_vm2, %v1201_v56  ;;  %2908 = vmatmul.mubr.msk.f32.vlgmr.msra.gmra.mrb[20].mxu0 %vm676_vm2, %v1201_v56  ;;  %v2478_v15 = vmul.f32 %v3513_v60, %v3528_v10 }
 0x366   : > { %2003 = vmatpush1.msra.mxu1 %v3383_v53  ;;  %2080 = vmatpush1.msra.mxu0 %v3388_v61  ;;  %v2523_v34 = vadd.f32 %v3536_v13, %v2479_v17  ;;  %v2552_v22 = vmax.f32 %v2520_v20, 0.0  ;;  %v2553_v40 = vmax.f32 %v2521_v33, 0.0  ;;  %v2481_v53 = vmul.f32 %v3513_v60, %v3581_v26 }
 0x367   : > { %1918 = vmatprep.mubr.f32.mxu1 %v3050_v58  ;;  %1995 = vmatprep.mubr.f32.mxu0 %v3050_v58  ;;  %v2522_v29 = vadd.f32 %v3536_v13, %v2478_v15  ;;  %v2483_v61 = vmul.f32 %v3513_v60, %v3584_v28 }
 0x368   : > { %2156 = vmatprep.subr.mxu1 %v3395_v62  ;;  %2233 = vmatprep.subr.mxu0 %v3400_v63  ;;  %v2555_v42 = vmax.f32 %v2523_v34, 0.0  ;;  %v3605_v62 = vld [vmem:[%s3520_s18 + $0xa0] sm:$0xff]  ;;  %v3608_v63 = vld [vmem:[%s3520_s18 + $0xb0] sm:$0xff]  ;;  %v2525_v8 = vadd.f32 %v3536_v13, %v2481_v53 }
 0x369   : > { %2907 = vmatmul.mubr.msk.f32.gmra.mrb[26].mxu1 %vm676_vm2, %v1203_v59  ;;  %2909 = vmatmul.mubr.msk.f32.gmra.mrb[22].mxu0 %vm676_vm2, %v1203_v59  ;;  %v2554_v23 = vmax.f32 %v2522_v29, 0.0 }
 0x36a   : > { %2066 = vmatprep.mubr.f32.mxu1 %v3050_v58  ;;  %2143 = vmatprep.mubr.f32.mxu0 %v3050_v58 }
 0x36d   : > { %2910 = vmatmul.mubr.msk.f32.vlgmr.msra.gmra.mrb[28].mxu1 %vm676_vm2, %v1201_v56  ;;  %2912 = vmatmul.mubr.msk.f32.vlgmr.msra.gmra.mrb[24].mxu0 %vm676_vm2, %v1201_v56 }
 0x36e   : > { %2157 = vmatpush1.msra.mxu1 %v3415_v2  ;;  %2234 = vmatpush1.msra.mxu0 %v3420_v3  ;;  %v2524_v2 = vadd.f32 %v3536_v13, %v2480_v49  ;;  %v2526_v3 = vadd.f32 %v3536_v13, %v2482_v50 }
 0x36f   : > { %2072 = vmatprep.mubr.f32.mxu1 %v3050_v58  ;;  %2149 = vmatprep.mubr.f32.mxu0 %v3050_v58 }
 0x370   : > { %2310 = vmatprep.subr.mxu1 %v3427_v4  ;;  %2387 = vmatprep.subr.mxu0 %v3432_v5  ;;  %v3613_v4 = vld [vmem:[%s3520_s18 + $0xa8] sm:$0xff]  ;;  %v3616_v5 = vld [vmem:[%s3520_s18 + $0xb8] sm:$0xff] }
 0x371   : > { %2911 = vmatmul.mubr.msk.f32.gmra.mrb[30].mxu1 %vm676_vm2, %v1203_v59  ;;  %2913 = vmatmul.mubr.msk.f32.gmra.mrb[26].mxu0 %vm676_vm2, %v1203_v59 }
 0x372   : > { %2220 = vmatprep.mubr.f32.mxu1 %v3050_v58  ;;  %2297 = vmatprep.mubr.f32.mxu0 %v3050_v58 }
 0x375   : > { %2914 = vmatmul.mubr.msk.f32.vlgmr.msra.gmra.mrb[32].mxu1 %vm676_vm2, %v1201_v56  ;;  %2916 = vmatmul.mubr.msk.f32.vlgmr.msra.gmra.mrb[28].mxu0 %vm676_vm2, %v1201_v56 }
 0x376   : > { %2311 = vmatpush1.msra.mxu1 %v1216_v6  ;;  %2388 = vmatpush1.msra.mxu0 %v1218_v7 }
 0x377   : > { %2226 = vmatprep.mubr.f32.mxu1 %v3050_v58  ;;  %2303 = vmatprep.mubr.f32.mxu0 %v3050_v58 }
 0x379   : > { %2915 = vmatmul.mubr.msk.f32.gmra.mrb[34].mxu1 %vm676_vm2, %v1203_v59  ;;  %2917 = vmatmul.mubr.msk.f32.gmra.mrb[30].mxu0 %vm676_vm2, %v1203_v59 }
 0x37a   : > { %2374 = vmatprep.mubr.f32.mxu1 %v3050_v58  ;;  %2451 = vmatprep.mubr.f32.mxu0 %v3050_v58 }
 0x37d   : > { %2918 = vmatmul.mubr.msk.f32.vlgmr.msra.gmra.mrb[36].mxu1 %vm676_vm2, %v1201_v56  ;;  %2920 = vmatmul.mubr.msk.f32.vlgmr.msra.gmra.mrb[32].mxu0 %vm676_vm2, %v1201_v56  ;;  %v2527_v56 = vadd.f32 %v3536_v13, %v2483_v61 }
 0x37e   : > { %2380 = vmatprep.mubr.f32.mxu1 %v3050_v58  ;;  %2457 = vmatprep.mubr.f32.mxu0 %v3050_v58  ;;  %v3522_v58 = vpop.permute.xlu1 %2473 }
 0x37f   : > { %v2492_v35 = vmul.f32 %v3522_v58, %v3547_v18  ;;  %v2494_v36 = vmul.f32 %v3522_v58, %v3550_v19  ;;  %v2493_v37 = vmul.f32 %v3522_v58, %v3555_v30  ;;  %v2495_v39 = vmul.f32 %v3522_v58, %v3558_v31 }
 0x380   : > { %v2496_v16 = vmul.f32 %v3522_v58, %v3605_v62  ;;  %v2498_v17 = vmul.f32 %v3522_v58, %v3608_v63  ;;  %v2497_v33 = vmul.f32 %v3522_v58, %v3613_v4  ;;  %v2499_v34 = vmul.f32 %v3522_v58, %v3616_v5 }
 0x381   : > { %2919 = vmatmul.mubr.msk.f32.gmra.mrb[38].mxu1 %vm676_vm2, %v1203_v59  ;;  %2921 = vmatmul.mubr.msk.f32.gmra.mrb[34].mxu0 %vm676_vm2, %v1203_v59 }
 0x382   : > { %v3560_v32 = vpop.permute.xlu1 %2517 }
 0x383   : > { %v2536_v24 = vadd.f32 %v3560_v32, %v2492_v35  ;;  %v2538_v25 = vadd.f32 %v3560_v32, %v2494_v36  ;;  %v2537_v43 = vadd.f32 %v3560_v32, %v2493_v37  ;;  %v2539_v44 = vadd.f32 %v3560_v32, %v2495_v39  ;;  %v3637_v35 = vld [vmem:[%s3520_s18 + $0x40] sm:$0xff]  ;;  %v3640_v36 = vld [vmem:[%s3520_s18 + $0x50] sm:$0xff] }
 0x384   : > { %v2556_v37 = vmax.f32 %v2524_v2, 0.0  ;;  %v2558_v39 = vmax.f32 %v2526_v3, 0.0  ;;  %v2484_v53 = vmul.f32 %v3513_v60, %v3637_v35  ;;  %v2486_v61 = vmul.f32 %v3513_v60, %v3640_v36 }
 0x385   : > { %v2568_v0 = vmax.f32 %v2536_v24, 0.0  ;;  %v2570_v1 = vmax.f32 %v2538_v25, 0.0  ;;  %v2569_v54 = vmax.f32 %v2537_v43, 0.0  ;;  %v2571_v55 = vmax.f32 %v2539_v44, 0.0  ;;  %v3645_v24 = vld [vmem:[%s3520_s18 + $0x48] sm:$0xff]  ;;  %v3648_v25 = vld [vmem:[%s3520_s18 + $0x58] sm:$0xff] }
 0x386   : > { %v2541_v43 = vadd.f32 %v3560_v32, %v2497_v33  ;;  %v2543_v44 = vadd.f32 %v3560_v32, %v2499_v34  ;;  %v2485_v2 = vmul.f32 %v3513_v60, %v3645_v24  ;;  %v2487_v3 = vmul.f32 %v3513_v60, %v3648_v25 }
 0x388   : > { %v2573_v33 = vmax.f32 %v2541_v43, 0.0  ;;  %v2575_v34 = vmax.f32 %v2543_v44, 0.0 }
 0x3d0   : > { %v1292_v41 = vpop.f32.mrb[8].mxu1  ;;  %v1369_v38 = vpop.f32.mrb[4].mxu0 }
 0x3d1   : > { %v3588_v45 = vmul.f32 %v2552_v22, %v1292_v41  ;;  %v3590_v46 = vmul.f32 %v2554_v23, %v1369_v38  ;;  %v1294_v47 = vpop.f32.mrb[9].mxu1  ;;  %v1371_v48 = vpop.f32.mrb[5].mxu0  ;;  %v2540_v22 = vadd.f32 %v3560_v32, %v2496_v16  ;;  %v2542_v23 = vadd.f32 %v3560_v32, %v2498_v17 }
 0x3d2   : > { %v3596_v51 = vmul.f32 %v2553_v40, %v1294_v47  ;;  %v3598_v52 = vmul.f32 %v2555_v42, %v1371_v48  ;;  %v2557_v40 = vmax.f32 %v2525_v8, 0.0  ;;  %v2559_v42 = vmax.f32 %v2527_v56, 0.0 }
 0x3d3   : > { %v2528_v8 = vadd.f32 %v3536_v13, %v2484_v53  ;;  %v2530_v56 = vadd.f32 %v3536_v13, %v2486_v61  ;;  %v3701_v53 = vld [vmem:[%s3520_s18 + $0x60] sm:$0xff]  ;;  %v3704_v61 = vld [vmem:[%s3520_s18 + $0x70] sm:$0xff] }
 0x3d4   : > { %v1298_v6 = vpop.f32.mrb[10].mxu1  ;;  %v1375_v7 = vpop.f32.mrb[6].mxu0  ;;  %3997 = vst [vmem:[#allocation6_spill] sm:$0xff] %v3701_v53  ;;  %3998 = vst [vmem:[#allocation7_spill] sm:$0xff] %v3704_v61 }
 0x3d5   : > { %v3620_v57 = vmul.f32 %v2568_v0, %v1298_v6  ;;  %v3622_v59 = vmul.f32 %v2570_v1, %v1375_v7  ;;  %v1300_v14 = vpop.f32.mrb[11].mxu1  ;;  %v1377_v15 = vpop.f32.mrb[7].mxu0  ;;  %v3669_v6 = vld [vmem:[%s3520_s18 + $0xc0] sm:$0xff]  ;;  %v3672_v7 = vld [vmem:[%s3520_s18 + $0xd0] sm:$0xff] }
 0x3d6   : > { %v3628_v20 = vmul.f32 %v2569_v54, %v1300_v14  ;;  %v3630_v29 = vmul.f32 %v2571_v55, %v1377_v15  ;;  %3993 = vst [vmem:[#allocation2_spill] sm:$0xff] %v3669_v6  ;;  %3994 = vst [vmem:[#allocation3_spill] sm:$0xff] %v3672_v7  ;;  %v2572_v54 = vmax.f32 %v2540_v22, 0.0  ;;  %v2574_v55 = vmax.f32 %v2542_v23, 0.0  ;;  %v3677_v14 = vld [vmem:[%s3520_s18 + $0xc8] sm:$0xff]  ;;  %v3680_v15 = vld [vmem:[%s3520_s18 + $0xd8] sm:$0xff] }
 0x3d7   : > { %3995 = vst [vmem:[#allocation4_spill] sm:$0xff] %v3677_v14  ;;  %3996 = vst [vmem:[#allocation5_spill] sm:$0xff] %v3680_v15 }
 0x3d8   : > { %v1446_v41 = vpop.f32.mrb[12].mxu1  ;;  %v1523_v38 = vpop.f32.mrb[8].mxu0 }
 0x3d9   : > { %v3652_v47 = vmul.f32 %v2556_v37, %v1446_v41  ;;  %v3654_v48 = vmul.f32 %v2558_v39, %v1523_v38  ;;  %v1448_v49 = vpop.f32.mrb[13].mxu1  ;;  %v1525_v50 = vpop.f32.mrb[9].mxu0  ;;  %v2529_v37 = vadd.f32 %v3536_v13, %v2485_v2  ;;  %v2531_v39 = vadd.f32 %v3536_v13, %v2487_v3 }
 0x3da   : > { %v3660_v0 = vmul.f32 %v2557_v40, %v1448_v49  ;;  %v3662_v1 = vmul.f32 %v2559_v42, %v1525_v50  ;;  %v2500_v40 = vmul.f32 %v3522_v58, %v3669_v6  ;;  %v2502_v42 = vmul.f32 %v3522_v58, %v3672_v7 }
 0x3db   : > { %v2501_v49 = vmul.f32 %v3522_v58, %v3677_v14  ;;  %v2503_v50 = vmul.f32 %v3522_v58, %v3680_v15  ;;  %v2560_v2 = vmax.f32 %v2528_v8, 0.0  ;;  %v2562_v3 = vmax.f32 %v2530_v56, 0.0 }
 0x3dc   : > { %v1452_v16 = vpop.f32.mrb[14].mxu1  ;;  %v1529_v17 = vpop.f32.mrb[10].mxu0  ;;  %v2488_v7 = vmul.f32 %v3513_v60, %v3701_v53  ;;  %v2490_v6 = vmul.f32 %v3513_v60, %v3704_v61 }
 0x3dd   : > { %v3684_v22 = vmul.f32 %v2572_v54, %v1452_v16  ;;  %v3686_v23 = vmul.f32 %v2574_v55, %v1529_v17  ;;  %v1454_v41 = vpop.f32.mrb[15].mxu1  ;;  %v1531_v38 = vpop.f32.mrb[11].mxu0  ;;  %v2544_v54 = vadd.f32 %v3560_v32, %v2500_v40  ;;  %v2546_v55 = vadd.f32 %v3560_v32, %v2502_v42  ;;  %v3709_v16 = vld [vmem:[%s3520_s18 + $0x68] sm:$0xff]  ;;  %v3712_v17 = vld [vmem:[%s3520_s18 + $0x78] sm:$0xff] }
 0x3de   : > { %v3692_v43 = vmul.f32 %v2573_v33, %v1454_v41  ;;  %v3694_v44 = vmul.f32 %v2575_v34, %v1531_v38  ;;  %3999 = vst [vmem:[#allocation8_spill] sm:$0xff] %v3709_v16  ;;  %4000 = vst [vmem:[#allocation9_spill] sm:$0xff] %v3712_v17  ;;  %v2561_v41 = vmax.f32 %v2529_v37, 0.0  ;;  %v2563_v38 = vmax.f32 %v2531_v39, 0.0 }
 0x3df   : > { %v2545_v15 = vadd.f32 %v3560_v32, %v2501_v49  ;;  %v2547_v14 = vadd.f32 %v3560_v32, %v2503_v50  ;;  %v2489_v49 = vmul.f32 %v3513_v60, %v3709_v16  ;;  %v2491_v50 = vmul.f32 %v3513_v60, %v3712_v17 }
 0x3e0   : > { %v1600_v33 = vpop.f32.mrb[16].mxu1  ;;  %v1677_v34 = vpop.f32.mrb[12].mxu0  ;;  %v2532_v53 = vadd.f32 %v3536_v13, %v2488_v7  ;;  %v2534_v61 = vadd.f32 %v3536_v13, %v2490_v6 }
 0x3e1   : > { %v3716_v8 = vmul.f32 %v2560_v2, %v1600_v33  ;;  %v3718_v56 = vmul.f32 %v2562_v3, %v1677_v34  ;;  %v1602_v40 = vpop.f32.mrb[17].mxu1  ;;  %v1679_v42 = vpop.f32.mrb[13].mxu0  ;;  %v3733_v2 = vld [vmem:[%s3520_s18 + $0xe0] sm:$0xff]  ;;  %v3736_v3 = vld [vmem:[%s3520_s18 + $0xf0] sm:$0xff]  ;;  %v2576_v33 = vmax.f32 %v2544_v54, 0.0  ;;  %v2578_v34 = vmax.f32 %v2546_v55, 0.0 }
 0x3e2   : > { %v3724_v37 = vmul.f32 %v2561_v41, %v1602_v40  ;;  %v3726_v39 = vmul.f32 %v2563_v38, %v1679_v42  ;;  %4005 = vst [vmem:[#allocation14_spill] sm:$0xff] %v3733_v2  ;;  %4006 = vst [vmem:[#allocation15_spill] sm:$0xff] %v3736_v3  ;;  %v3741_v41 = vld [vmem:[%s3520_s18 + $0xe8] sm:$0xff]  ;;  %v3744_v38 = vld [vmem:[%s3520_s18 + $0xf8] sm:$0xff]  ;;  %v2577_v16 = vmax.f32 %v2545_v15, 0.0  ;;  %v2533_v60 = vadd.f32 %v3536_v13, %v2489_v49 }
 0x3e3   : > { %4001 = vst [vmem:[#allocation10_spill] sm:$0xff] %v3716_v8  ;;  %4002 = vst [vmem:[#allocation11_spill] sm:$0xff] %v3718_v56  ;;  %v2535_v17 = vadd.f32 %v3536_v13, %v2491_v50  ;;  %v2504_v6 = vmul.f32 %v3522_v58, %v3733_v2  ;;  %v2506_v56 = vmul.f32 %v3522_v58, %v3736_v3  ;;  %v2564_v49 = vmax.f32 %v2532_v53, 0.0 }
 0x3e4   : > { %4003 = vst [vmem:[#allocation12_spill] sm:$0xff] %v3724_v37  ;;  %4004 = vst [vmem:[#allocation13_spill] sm:$0xff] %v3726_v39  ;;  %v1606_v40 = vpop.f32.mrb[18].mxu1  ;;  %v1683_v42 = vpop.f32.mrb[14].mxu0  ;;  %v2579_v39 = vmax.f32 %v2547_v14, 0.0  ;;  %v2505_v14 = vmul.f32 %v3522_v58, %v3741_v41  ;;  %v2507_v13 = vmul.f32 %v3522_v58, %v3744_v38  ;;  %v2566_v50 = vmax.f32 %v2534_v61, 0.0 }
 0x3e5   : > { %4007 = vst [vmem:[#allocation16_spill] sm:$0xff] %v3741_v41  ;;  %4008 = vst [vmem:[#allocation17_spill] sm:$0xff] %v3744_v38  ;;  %v3748_v37 = vmul.f32 %v2576_v33, %v1606_v40  ;;  %v3750_v54 = vmul.f32 %v2578_v34, %v1683_v42  ;;  %v1608_v55 = vpop.f32.mrb[19].mxu1  ;;  %v1685_v7 = vpop.f32.mrb[15].mxu0  ;;  %v2548_v33 = vadd.f32 %v3560_v32, %v2504_v6  ;;  %v2565_v2 = vmax.f32 %v2533_v60, 0.0 }
 0x3e6   : > { %v3756_v8 = vmul.f32 %v2577_v16, %v1608_v55  ;;  %v3758_v15 = vmul.f32 %v2579_v39, %v1685_v7  ;;  %v2550_v34 = vadd.f32 %v3560_v32, %v2506_v56  ;;  %v2567_v3 = vmax.f32 %v2535_v17, 0.0 }
 0x3e7   : > { %v2549_v16 = vadd.f32 %v3560_v32, %v2505_v14  ;;  %v2551_v39 = vadd.f32 %v3560_v32, %v2507_v13  ;;  %v2580_v6 = vmax.f32 %v2548_v33, 0.0 }
 0x3e8   : > { %4009 = vst [vmem:[#allocation18_spill] sm:$0xff] %v3756_v8  ;;  %4010 = vst [vmem:[#allocation19_spill] sm:$0xff] %v3758_v15  ;;  %v1754_v40 = vpop.f32.mrb[20].mxu1  ;;  %v1831_v42 = vpop.f32.mrb[16].mxu0  ;;  %v2582_v56 = vmax.f32 %v2550_v34, 0.0 }
 0x3e9   : > { %v3768_v55 = vmul.f32 %v2564_v49, %v1754_v40  ;;  %v3770_v7 = vmul.f32 %v2566_v50, %v1831_v42  ;;  %v1756_v41 = vpop.f32.mrb[21].mxu1  ;;  %v1833_v58 = vpop.f32.mrb[17].mxu0  ;;  %v2581_v60 = vmax.f32 %v2549_v16, 0.0  ;;  %v2583_v17 = vmax.f32 %v2551_v39, 0.0 }
 0x3ea   : > { %v3772_v53 = vmul.f32 %v2565_v2, %v1756_v41  ;;  %v3774_v61 = vmul.f32 %v2567_v3, %v1833_v58  ;;  %v3784_v2 = vpop.permute.xlu0 %2588  ;;  %v3786_v3 = vpop.permute.xlu1 %2593 }
 0x3eb   : > { %v2596_v33 = vmul.f32 %v3784_v2, %v3525_v9  ;;  %v2599_v34 = vmul.f32 %v3784_v2, %v3534_v12  ;;  %v2614_v12 = vmul.f32 %v3786_v3, %v3550_v19 }
 0x3ec   : > { %v1760_v38 = vpop.f32.mrb[22].mxu1  ;;  %v1837_v15 = vpop.f32.mrb[18].mxu0 }
 0x3ed   : > { %v3776_v8 = vmul.f32 %v2580_v6, %v1760_v38  ;;  %v3778_v14 = vmul.f32 %v2582_v56, %v1837_v15  ;;  %v1762_v32 = vpop.f32.mrb[23].mxu1  ;;  %v1839_v13 = vpop.f32.mrb[19].mxu0  ;;  %v2598_v38 = vmul.f32 %v3784_v2, %v3528_v10  ;;  %v2597_v15 = vmul.f32 %v3784_v2, %v3531_v11 }
 0x3ee   : > { %v3780_v49 = vmul.f32 %v2581_v60, %v1762_v32  ;;  %v3782_v50 = vmul.f32 %v2583_v17, %v1839_v13  ;;  %v3788_v41 = vpop.permute.xlu0 %2632  ;;  %v3798_v40 = vpop.permute.xlu1 %2637  ;;  %v2612_v11 = vmul.f32 %v3786_v3, %v3547_v18 }
 0x3ef   : > { %v2640_v42 = vadd.f32 %v3788_v41, %v2596_v33  ;;  %v2642_v16 = vadd.f32 %v3788_v41, %v2598_v38  ;;  %v2641_v9 = vadd.f32 %v3788_v41, %v2597_v15  ;;  %v2643_v6 = vadd.f32 %v3788_v41, %v2599_v34 }
 0x3f0   : > { %v2613_v33 = vmul.f32 %v3786_v3, %v3555_v30  ;;  %v2615_v38 = vmul.f32 %v3786_v3, %v3558_v31  ;;  %v2656_v15 = vadd.f32 %v3798_v40, %v2612_v11  ;;  %v2658_v34 = vadd.f32 %v3798_v40, %v2614_v12 }
 0x3f2   : > { %v2657_v30 = vadd.f32 %v3798_v40, %v2613_v33  ;;  %v2659_v31 = vadd.f32 %v3798_v40, %v2615_v38 }
 0x438   : > { %v1914_v39 = vpop.f32.mrb[24].mxu1  ;;  %v1991_v58 = vpop.f32.mrb[20].mxu0 }
 0x439   : > { %v2704_v10 = vmul.f32 %v2640_v42, %v1914_v39  ;;  %v2706_v56 = vmul.f32 %v2642_v16, %v1991_v58  ;;  %v1916_v60 = vpop.f32.mrb[25].mxu1  ;;  %v1993_v17 = vpop.f32.mrb[21].mxu0 }
 0x43a   : > { %v2705_v32 = vmul.f32 %v2641_v9, %v1916_v60  ;;  %v2707_v13 = vmul.f32 %v2643_v6, %v1993_v17  ;;  %v2601_v60 = vmul.f32 %v3784_v2, %v3581_v26  ;;  %v2603_v17 = vmul.f32 %v3784_v2, %v3584_v28 }
 0x43b   : > { %v2736_v18 = vadd.f32 %v2704_v10, %v3588_v45  ;;  %v2738_v19 = vadd.f32 %v2706_v56, %v3590_v46  ;;  %v2600_v10 = vmul.f32 %v3784_v2, %v3573_v27 }
 0x43c   : > { %v2737_v42 = vadd.f32 %v2705_v32, %v3596_v51  ;;  %v2739_v16 = vadd.f32 %v2707_v13, %v3598_v52  ;;  %v1920_v39 = vpop.f32.mrb[26].mxu1  ;;  %v1997_v58 = vpop.f32.mrb[22].mxu0  ;;  %v2602_v51 = vmul.f32 %v3784_v2, %v3576_v21  ;;  %v2645_v26 = vadd.f32 %v3788_v41, %v2601_v60 }
 0x43d   : > { %2768 = vst [vmem:[%s3813_s23] sm:$0xff] %v2736_v18  ;;  %2770 = vst [vmem:[%s3813_s23 + $0x10] sm:$0xff] %v2738_v19  ;;  %v2720_v45 = vmul.f32 %v2656_v15, %v1920_v39  ;;  %v2722_v46 = vmul.f32 %v2658_v34, %v1997_v58  ;;  %v1922_v9 = vpop.f32.mrb[27].mxu1  ;;  %v1999_v6 = vpop.f32.mrb[23].mxu0  ;;  %v2644_v27 = vadd.f32 %v3788_v41, %v2600_v10 }
 0x43e   : > { %2769 = vst [vmem:[%s3813_s23 + $0x8] sm:$0xff] %v2737_v42  ;;  %2771 = vst [vmem:[%s3813_s23 + $0x18] sm:$0xff] %v2739_v16  ;;  %v2721_v52 = vmul.f32 %v2657_v30, %v1922_v9  ;;  %v2723_v56 = vmul.f32 %v2659_v31, %v1999_v6  ;;  %v2646_v21 = vadd.f32 %v3788_v41, %v2602_v51 }
 0x43f   : > { %v2752_v11 = vadd.f32 %v2720_v45, %v3620_v57  ;;  %v2754_v12 = vadd.f32 %v2722_v46, %v3622_v59  ;;  %v2647_v28 = vadd.f32 %v3788_v41, %v2603_v17  ;;  %v2616_v15 = vmul.f32 %v3786_v3, %v3605_v62 }
 0x440   : > { %v2753_v32 = vadd.f32 %v2721_v52, %v3628_v20  ;;  %v2755_v13 = vadd.f32 %v2723_v56, %v3630_v29  ;;  %v2068_v33 = vpop.f32.mrb[28].mxu1  ;;  %v2145_v38 = vpop.f32.mrb[24].mxu0  ;;  %v2618_v20 = vmul.f32 %v3786_v3, %v3608_v63  ;;  %v2617_v42 = vmul.f32 %v3786_v3, %v3613_v4 }
 0x441   : > { %2784 = vst [vmem:[%s3813_s23 + $0x80] sm:$0xff] %v2752_v11  ;;  %2786 = vst [vmem:[%s3813_s23 + $0x90] sm:$0xff] %v2754_v12  ;;  %v2708_v57 = vmul.f32 %v2644_v27, %v2068_v33  ;;  %v2710_v59 = vmul.f32 %v2646_v21, %v2145_v38  ;;  %v2070_v18 = vpop.f32.mrb[29].mxu1  ;;  %v2147_v19 = vpop.f32.mrb[25].mxu0  ;;  %v2619_v16 = vmul.f32 %v3786_v3, %v3616_v5  ;;  %v4011_v33 = vld [vmem:[#allocation2_spill] sm:$0xff] }
 0x442   : > { %2785 = vst [vmem:[%s3813_s23 + $0x88] sm:$0xff] %v2753_v32  ;;  %2787 = vst [vmem:[%s3813_s23 + $0x98] sm:$0xff] %v2755_v13  ;;  %v2709_v29 = vmul.f32 %v2645_v26, %v2070_v18  ;;  %v2711_v34 = vmul.f32 %v2647_v28, %v2147_v19  ;;  %v2660_v62 = vadd.f32 %v3798_v40, %v2616_v15  ;;  %v4012_v26 = vld [vmem:[#allocation3_spill] sm:$0xff]  ;;  %v4014_v18 = vld [vmem:[#allocation5_spill] sm:$0xff] }
 0x443   : > { %v2740_v39 = vadd.f32 %v2708_v57, %v3652_v47  ;;  %v2742_v58 = vadd.f32 %v2710_v59, %v3654_v48  ;;  %v2662_v63 = vadd.f32 %v3798_v40, %v2618_v20  ;;  %v2661_v4 = vadd.f32 %v3798_v40, %v2617_v42  ;;  %v4013_v57 = vld [vmem:[#allocation4_spill] sm:$0xff]  ;;  %v4015_v15 = vld [vmem:[#allocation10_spill] sm:$0xff] }
 0x444   : > { %v2741_v30 = vadd.f32 %v2709_v29, %v3660_v0  ;;  %v2743_v31 = vadd.f32 %v2711_v34, %v3662_v1  ;;  %v2074_v45 = vpop.f32.mrb[30].mxu1  ;;  %v2151_v46 = vpop.f32.mrb[26].mxu0  ;;  %v2663_v5 = vadd.f32 %v3798_v40, %v2619_v16  ;;  %v2604_v10 = vmul.f32 %v3784_v2, %v3637_v35  ;;  %v4016_v29 = vld [vmem:[#allocation11_spill] sm:$0xff] }
 0x445   : > { %2772 = vst [vmem:[%s3813_s23 + $0x20] sm:$0xff] %v2740_v39  ;;  %2774 = vst [vmem:[%s3813_s23 + $0x30] sm:$0xff] %v2742_v58  ;;  %v2724_v47 = vmul.f32 %v2660_v62, %v2074_v45  ;;  %v2726_v48 = vmul.f32 %v2662_v63, %v2151_v46  ;;  %v2076_v9 = vpop.f32.mrb[31].mxu1  ;;  %v2153_v6 = vpop.f32.mrb[27].mxu0  ;;  %v2606_v0 = vmul.f32 %v3784_v2, %v3640_v36  ;;  %v4017_v39 = vld [vmem:[#allocation12_spill] sm:$0xff]  ;;  %v4018_v62 = vld [vmem:[#allocation13_spill] sm:$0xff] }
 0x446   : > { %2773 = vst [vmem:[%s3813_s23 + $0x28] sm:$0xff] %v2741_v30  ;;  %2775 = vst [vmem:[%s3813_s23 + $0x38] sm:$0xff] %v2743_v31  ;;  %v2725_v1 = vmul.f32 %v2661_v4, %v2076_v9  ;;  %v2727_v51 = vmul.f32 %v2663_v5, %v2153_v6  ;;  %v2605_v52 = vmul.f32 %v3784_v2, %v3645_v24  ;;  %v4019_v9 = vld [vmem:[#allocation6_spill] sm:$0xff] }
 0x447   : > { %v2607_v56 = vmul.f32 %v3784_v2, %v3648_v25  ;;  %v2756_v60 = vadd.f32 %v2724_v47, %v3684_v22  ;;  %v2758_v17 = vadd.f32 %v2726_v48, %v3686_v23  ;;  %v2648_v35 = vadd.f32 %v3788_v41, %v2604_v10  ;;  %v4020_v10 = vld [vmem:[#allocation7_spill] sm:$0xff] }
 0x448   : > { %v2650_v36 = vadd.f32 %v3788_v41, %v2606_v0  ;;  %v2757_v11 = vadd.f32 %v2725_v1, %v3692_v43  ;;  %v2759_v12 = vadd.f32 %v2727_v51, %v3694_v44  ;;  %v2222_v27 = vpop.f32.mrb[32].mxu1  ;;  %v2299_v21 = vpop.f32.mrb[28].mxu0  ;;  %v2649_v24 = vadd.f32 %v3788_v41, %v2605_v52  ;;  %v4021_v52 = vld [vmem:[#allocation8_spill] sm:$0xff] }
 0x449   : > { %v2651_v25 = vadd.f32 %v3788_v41, %v2607_v56  ;;  %2788 = vst [vmem:[%s3813_s23 + $0xa0] sm:$0xff] %v2756_v60  ;;  %2790 = vst [vmem:[%s3813_s23 + $0xb0] sm:$0xff] %v2758_v17  ;;  %v2712_v22 = vmul.f32 %v2648_v35, %v2222_v27  ;;  %v2224_v32 = vpop.f32.mrb[33].mxu1  ;;  %v2301_v13 = vpop.f32.mrb[29].mxu0  ;;  %v2620_v38 = vmul.f32 %v3786_v3, %v4011_v33  ;;  %v4022_v60 = vld [vmem:[#allocation9_spill] sm:$0xff]  ;;  %v4023_v27 = vld [vmem:[#allocation18_spill] sm:$0xff] }
 0x44a   : > { %v2714_v23 = vmul.f32 %v2650_v36, %v2299_v21  ;;  %v2622_v43 = vmul.f32 %v3786_v3, %v4012_v26  ;;  %2789 = vst [vmem:[%s3813_s23 + $0xa8] sm:$0xff] %v2757_v11  ;;  %2791 = vst [vmem:[%s3813_s23 + $0xb8] sm:$0xff] %v2759_v12  ;;  %v2713_v44 = vmul.f32 %v2649_v24, %v2224_v32  ;;  %v4024_v24 = vld [vmem:[#allocation19_spill] sm:$0xff] }
 0x44b   : > { %v2715_v28 = vmul.f32 %v2651_v25, %v2301_v13  ;;  %v2621_v59 = vmul.f32 %v3786_v3, %v4013_v57  ;;  %v2623_v19 = vmul.f32 %v3786_v3, %v4014_v18  ;;  %v2744_v20 = vadd.f32 %v2712_v22, %v4015_v15  ;;  %v4028_v18 = vld [vmem:[#allocation17_spill] sm:$0xff] }
 0x44c   : > { %v2746_v34 = vadd.f32 %v2714_v23, %v4016_v29  ;;  %v2664_v42 = vadd.f32 %v3798_v40, %v2620_v38  ;;  %v2666_v16 = vadd.f32 %v3798_v40, %v2622_v43  ;;  %v2745_v58 = vadd.f32 %v2713_v44, %v4017_v39  ;;  %v2228_v30 = vpop.f32.mrb[34].mxu1  ;;  %v2305_v31 = vpop.f32.mrb[30].mxu0  ;;  %v4025_v38 = vld [vmem:[#allocation14_spill] sm:$0xff]  ;;  %v4026_v43 = vld [vmem:[#allocation15_spill] sm:$0xff] }
 0x44d   : > { %v2747_v63 = vadd.f32 %v2715_v28, %v4018_v62  ;;  %v2665_v45 = vadd.f32 %v3798_v40, %v2621_v59  ;;  %v2667_v46 = vadd.f32 %v3798_v40, %v2623_v19  ;;  %2776 = vst [vmem:[%s3813_s23 + $0x40] sm:$0xff] %v2744_v20  ;;  %v2230_v47 = vpop.f32.mrb[35].mxu1  ;;  %v2307_v48 = vpop.f32.mrb[31].mxu0  ;;  %v2608_v6 = vmul.f32 %v3784_v2, %v4019_v9  ;;  %v4027_v59 = vld [vmem:[#allocation16_spill] sm:$0xff] }
 0x44e   : > { %2778 = vst [vmem:[%s3813_s23 + $0x50] sm:$0xff] %v2746_v34  ;;  %v2728_v4 = vmul.f32 %v2664_v42, %v2228_v30  ;;  %v2730_v5 = vmul.f32 %v2666_v16, %v2305_v31  ;;  %v2610_v0 = vmul.f32 %v3784_v2, %v4020_v10  ;;  %2777 = vst [vmem:[%s3813_s23 + $0x48] sm:$0xff] %v2745_v58 }
 0x44f   : > { %2779 = vst [vmem:[%s3813_s23 + $0x58] sm:$0xff] %v2747_v63  ;;  %v2729_v1 = vmul.f32 %v2665_v45, %v2230_v47  ;;  %v2731_v51 = vmul.f32 %v2667_v46, %v2307_v48  ;;  %v2609_v56 = vmul.f32 %v3784_v2, %v4021_v52  ;;  %v2611_v17 = vmul.f32 %v3784_v2, %v4022_v60 }
 0x450   : > { %v2760_v35 = vadd.f32 %v2728_v4, %v3748_v37  ;;  %v2762_v36 = vadd.f32 %v2730_v5, %v3750_v54  ;;  %v2652_v11 = vadd.f32 %v3788_v41, %v2608_v6  ;;  %v2654_v12 = vadd.f32 %v3788_v41, %v2610_v0  ;;  %v2376_v22 = vpop.f32.mrb[36].mxu1  ;;  %v2453_v23 = vpop.f32.mrb[32].mxu0 }
 0x451   : > { %v2761_v21 = vadd.f32 %v2729_v1, %v4023_v27  ;;  %v2763_v25 = vadd.f32 %v2731_v51, %v4024_v24  ;;  %v2653_v32 = vadd.f32 %v3788_v41, %v2609_v56  ;;  %v2655_v2 = vadd.f32 %v3788_v41, %v2611_v17  ;;  %v2378_v13 = vpop.f32.mrb[37].mxu1  ;;  %v2455_v33 = vpop.f32.mrb[33].mxu0 }
 0x452   : > { %2792 = vst [vmem:[%s3813_s23 + $0xc0] sm:$0xff] %v2760_v35  ;;  %2794 = vst [vmem:[%s3813_s23 + $0xd0] sm:$0xff] %v2762_v36  ;;  %v2716_v37 = vmul.f32 %v2652_v11, %v2376_v22  ;;  %v2718_v54 = vmul.f32 %v2654_v12, %v2453_v23  ;;  %v2624_v26 = vmul.f32 %v3786_v3, %v4025_v38 }
 0x453   : > { %v2626_v44 = vmul.f32 %v3786_v3, %v4026_v43  ;;  %2793 = vst [vmem:[%s3813_s23 + $0xc8] sm:$0xff] %v2761_v21  ;;  %2795 = vst [vmem:[%s3813_s23 + $0xd8] sm:$0xff] %v2763_v25  ;;  %v2717_v28 = vmul.f32 %v2653_v32, %v2378_v13  ;;  %v2719_v57 = vmul.f32 %v2655_v2, %v2455_v33 }
 0x454   : > { %v2625_v41 = vmul.f32 %v3786_v3, %v4027_v59  ;;  %v2627_v19 = vmul.f32 %v3786_v3, %v4028_v18  ;;  %v2748_v15 = vadd.f32 %v2716_v37, %v3768_v55  ;;  %v2750_v20 = vadd.f32 %v2718_v54, %v3770_v7  ;;  %v2382_v39 = vpop.f32.mrb[38].mxu1  ;;  %v2459_v58 = vpop.f32.mrb[34].mxu0 }
 0x455   : > { %v2668_v29 = vadd.f32 %v3798_v40, %v2624_v26  ;;  %v2670_v34 = vadd.f32 %v3798_v40, %v2626_v44  ;;  %v2749_v42 = vadd.f32 %v2717_v28, %v3772_v53  ;;  %v2751_v16 = vadd.f32 %v2719_v57, %v3774_v61  ;;  %v2384_v63 = vpop.f32.mrb[39].mxu1  ;;  %v2461_v30 = vpop.f32.mrb[35].mxu0 }
 0x456   : > { %v2669_v62 = vadd.f32 %v3798_v40, %v2625_v41  ;;  %v2671_v3 = vadd.f32 %v3798_v40, %v2627_v19  ;;  %2780 = vst [vmem:[%s3813_s23 + $0x60] sm:$0xff] %v2748_v15  ;;  %2782 = vst [vmem:[%s3813_s23 + $0x70] sm:$0xff] %v2750_v20 }
 0x457   : > { %v2732_v55 = vmul.f32 %v2668_v29, %v2382_v39  ;;  %v2734_v7 = vmul.f32 %v2670_v34, %v2459_v58  ;;  %2781 = vst [vmem:[%s3813_s23 + $0x68] sm:$0xff] %v2749_v42  ;;  %2783 = vst [vmem:[%s3813_s23 + $0x78] sm:$0xff] %v2751_v16 }
 0x458   : > { %v2733_v53 = vmul.f32 %v2669_v62, %v2384_v63  ;;  %v2735_v61 = vmul.f32 %v2671_v3, %v2461_v30 }
 0x459   : > { %v2764_v31 = vadd.f32 %v2732_v55, %v3776_v8  ;;  %v2766_v45 = vadd.f32 %v2734_v7, %v3778_v14 }
 0x45a   : > { %v2765_v46 = vadd.f32 %v2733_v53, %v3780_v49  ;;  %v2767_v40 = vadd.f32 %v2735_v61, %v3782_v50 }
 0x45b   : > { %2796 = vst [vmem:[%s3813_s23 + $0xe0] sm:$0xff] %v2764_v31  ;;  %2798 = vst [vmem:[%s3813_s23 + $0xf0] sm:$0xff] %v2766_v45 }
 0x45c   : > { %2797 = vst [vmem:[%s3813_s23 + $0xe8] sm:$0xff] %v2765_v46  ;;  %2799 = vst [vmem:[%s3813_s23 + $0xf8] sm:$0xff] %v2767_v40 }
 0x45d PF: > { %s26_s21 = sadd.s32 1, %s3047_s21  }
 0x45e   : > { %p23_p4 = scmp.ge.s32.totalorder %s26_s21, 4  }
 0x460   :  { %25 = sbr.rel (!%p23_p4) target bundleno = 2 (0x2), region = 117 }

</bundles_post_ra>
